<compile_context>
chip_gen: v6e
topology: v6e:2x2x1
jax: 0.10.0
libtpu: 0.0.40
codegen_flags: <defaults>
</compile_context>

<pallas_src>
import functools
import math

import jax
import jax.numpy as jnp
from jax import lax
from jax.experimental import pallas as pl
from jax.experimental.pallas import tpu as pltpu

EPS = 1e-6
NEG_INF = -1e9
MIB = 1024 * 1024
TILE_CAP = 256          # row / query tile cap (VMEM-safe on v7x, good on v5e/v6e)


def _tile(n, cap=TILE_CAP):
    """Largest power-of-two tile <= cap (and >= 8) dividing n, else n itself."""
    t = cap
    while t >= 8:
        if n % t == 0:
            return t
        t //= 2
    return n


def _const_spec(shape):
    """BlockSpec for a grid-invariant (weight/bias) operand: same block at every
    grid step; single-buffered where the installed Pallas supports pipeline_mode."""
    zeros = (0,) * len(shape)
    try:
        return pl.BlockSpec(shape, lambda *_: zeros, pipeline_mode=pl.Buffered(1))
    except TypeError:                                   # older BlockSpec signature
        return pl.BlockSpec(shape, lambda *_: zeros)


def _compiler_params(dimension_semantics, est_vmem_bytes):
    # Explicit scoped-VMEM limit derived from chosen block sizes (+25% headroom),
    # clamped to [32 MiB, 96 MiB] (>= default scoped limit, sane for v7x's 64 MiB).
    limit = int(min(max(est_vmem_bytes * 1.25, 32 * MIB), 96 * MIB))
    return pltpu.CompilerParams(dimension_semantics=dimension_semantics,
                                vmem_limit_bytes=limit)


def _layernorm_f32(x, alpha, bias):
    # alpha * (x - mean) / (std + eps) + bias ; torch.std unbiased (N-1) variance.
    d = x.shape[-1]
    mean = jnp.mean(x, axis=-1, keepdims=True)
    diff = x - mean
    var = jnp.sum(diff * diff, axis=-1, keepdims=True) / (d - 1)
    inv = pl.reciprocal(jnp.sqrt(var) + EPS, approx=True)   # EUP slot, ~free
    return alpha * diff * inv + bias


# ---------------- 1) LayerNorm1 + fused QKV projection (row-tiled) -----------
def qkv_proj_kernel(n_heads, ln_ref, x_ref, wqkv_ref, bqkv_ref, qkv_ref):
    x = x_ref[0].astype(jnp.float32)                               # (tr, D)
    h = _layernorm_f32(x, ln_ref[0], ln_ref[1]).astype(jnp.bfloat16)
    qkv = jnp.dot(h, wqkv_ref[...], preferred_element_type=jnp.float32)
    qkv = (qkv + bqkv_ref[...]).astype(jnp.bfloat16)               # (tr, 3D)
    d_model = x.shape[-1]
    dk = d_model // n_heads
    # head-major scatter: static column slices -> qkv_ref[0, j] is (tr, dk)
    for j in range(3 * n_heads):
        qkv_ref[0, j] = qkv[:, j * dk:(j + 1) * dk]


def qkv_projection(x, p, n_heads):
    B, S, D = x.shape
    dk = D // n_heads
    tr = _tile(S)
    est = (2 * tr * D * 4                      # x block, double-buffered f32
           + D * 3 * D * 2 + 3 * D * 4         # Wqkv (single-buffered bf16) + bias
           + 2 * 3 * n_heads * tr * dk * 2     # head-major output, double-buffered
           + tr * 3 * D * 4 + tr * D * 4)      # in-kernel f32 intermediates
    return pl.pallas_call(
        functools.partial(qkv_proj_kernel, n_heads),
        out_shape=jax.ShapeDtypeStruct((B, 3 * n_heads, S, dk), jnp.bfloat16),
        grid=(B, S // tr),
        in_specs=[
            pl.BlockSpec(memory_space=pltpu.MemorySpace.SMEM),     # ln1 (alpha, bias)
            pl.BlockSpec((1, tr, D), lambda b, si: (b, si, 0)),    # x (residual stream)
            _const_spec((D, 3 * D)),                               # Wqkv (bf16)
            _const_spec((1, 3 * D)),                               # bqkv (f32)
        ],
        out_specs=pl.BlockSpec((1, 3 * n_heads, tr, dk),
                               lambda b, si: (b, 0, si, 0)),
        compiler_params=_compiler_params(("parallel", "parallel"), est),
    )(p["ln1"], x, p["wqkv"], p["bqkv"])


# ---------------- 2) per-(batch, head, q-tile) masked softmax attention ------
def attention_kernel(scale, mb_ref, q_ref, k_ref, v_ref, ctx_ref):
    q = q_ref[0, 0]                                                # (tq, dk) bf16
    k = k_ref[0, 0]                                                # (S,  dk) bf16
    v = v_ref[0, 0]                                                # (S,  dk) bf16
    # scores = q @ k^T  (contract last dims, no explicit transpose)
    s = lax.dot_general(q, k, (((1,), (1,)), ((), ())),
                        preferred_element_type=jnp.float32) * scale
    s = s + mb_ref[0]                                              # additive key mask
    s = s - jnp.max(s, axis=-1, keepdims=True)
    p = jnp.exp(s)
    denom = jnp.sum(p, axis=-1, keepdims=True)
    ctx = jnp.dot(p.astype(jnp.bfloat16), v,
                  preferred_element_type=jnp.float32)              # (tq, dk)
    # fold 1/sum into the small (tq, dk) context, not the (tq, S) prob matrix
    ctx = ctx * pl.reciprocal(denom, approx=True)
    ctx_ref[0, 0] = ctx.astype(ctx_ref.dtype)


def attention(qkv_hm, mask_bias, n_heads):
    B, _, S, dk = qkv_hm.shape
    scale = 1.0 / math.sqrt(dk)
    tq = _tile(S)
    est = (2 * S * 4                                   # mask bias
           + 2 * tq * dk * 2 + 2 * 2 * S * dk * 2      # Q tile + K/V (double-buffered)
           + 2 * tq * dk * 2                           # ctx output
           + 3 * tq * S * 4)                           # score / prob f32 intermediates
    return pl.pallas_call(
        functools.partial(attention_kernel, scale),
        out_shape=jax.ShapeDtypeStruct((B, n_heads, S, dk), jnp.bfloat16),
        grid=(B, n_heads, S // tq),
        in_specs=[
            pl.BlockSpec((1, 1, S), lambda b, h, qi: (b, 0, 0)),           # mask bias
            pl.BlockSpec((1, 1, tq, dk), lambda b, h, qi: (b, h, qi, 0)),  # Q (head h)
            pl.BlockSpec((1, 1, S, dk),                                    # K (head h)
                         lambda b, h, qi: (b, n_heads + h, 0, 0)),
            pl.BlockSpec((1, 1, S, dk),                                    # V (head h)
                         lambda b, h, qi: (b, 2 * n_heads + h, 0, 0)),
        ],
        out_specs=pl.BlockSpec((1, 1, tq, dk), lambda b, h, qi: (b, h, qi, 0)),
        compiler_params=_compiler_params(("parallel", "parallel", "parallel"), est),
    )(mask_bias, qkv_hm, qkv_hm, qkv_hm)


# ---------------- 3) O-projection + residual + LayerNorm2 + FFN + residual ---
def o_ffn_kernel(n_heads, ln_ref, x_ref, ctx_ref, wo_ref, bo_ref,
                 w1_ref, b1_ref, w2_ref, b2_ref, o_ref):
    x = x_ref[0].astype(jnp.float32)                               # (tm, D) residual in
    # concatenated multi-head context (static head count, aligned block reads)
    ctx = jnp.concatenate([ctx_ref[0, h] for h in range(n_heads)], axis=-1)
    # single D-wide O-projection matmul (full-K MXU contraction) + residual
    a = x + jnp.dot(ctx, wo_ref[...], preferred_element_type=jnp.float32) + bo_ref[...]
    h2 = _layernorm_f32(a, ln_ref[0], ln_ref[1]).astype(jnp.bfloat16)
    f = jnp.dot(h2, w1_ref[...], preferred_element_type=jnp.float32) + b1_ref[...]
    f = jnp.maximum(f, 0.0).astype(jnp.bfloat16)
    y = jnp.dot(f, w2_ref[...], preferred_element_type=jnp.float32) + b2_ref[...]
    o_ref[0] = (a + y).astype(o_ref.dtype)                         # second residual add


def o_proj_ffn(x, ctx_hm, p, n_heads):
    B, S, D = x.shape
    dk = D // n_heads
    FF = p["w1"].shape[1]
    tm = _tile(S)
    est = (2 * tm * D * 4                      # x block
           + 2 * tm * D * 2                    # ctx block
           + D * D * 2 + D * 4                 # Wo / bo (single-buffered)
           + D * FF * 2 + FF * 4               # W1 / b1 (single-buffered)
           + FF * D * 2 + D * 4                # W2 / b2 (single-buffered)
           + 2 * tm * D * 4                    # output block
           + tm * FF * 4 + 4 * tm * D * 4)     # f32 intermediates
    return pl.pallas_call(
        functools.partial(o_ffn_kernel, n_heads),
        out_shape=jax.ShapeDtypeStruct((B, S, D), x.dtype),
        grid=(B, S // tm),
        in_specs=[
            pl.BlockSpec(memory_space=pltpu.MemorySpace.SMEM),             # ln2
            pl.BlockSpec((1, tm, D), lambda b, si: (b, si, 0)),            # residual x
            pl.BlockSpec((1, n_heads, tm, dk), lambda b, si: (b, 0, si, 0)),  # ctx
            _const_spec((D, D)), _const_spec((1, D)),                      # Wo, bo
            _const_spec((D, FF)), _const_spec((1, FF)),                    # W1, b1
            _const_spec((FF, D)), _const_spec((1, D)),                     # W2, b2
        ],
        out_specs=pl.BlockSpec((1, tm, D), lambda b, si: (b, si, 0)),
        compiler_params=_compiler_params(("parallel", "parallel"), est),
    )(p["ln2"], x, ctx_hm, p["wo"], p["bo"], p["w1"], p["b1"], p["w2"], p["b2"])


# ---------------- final LayerNorm (row-tiled) ---------------------------------
def layernorm_kernel(ab_ref, x_ref, o_ref):
    x = x_ref[...].astype(jnp.float32)
    o_ref[...] = _layernorm_f32(x, ab_ref[0], ab_ref[1]).astype(o_ref.dtype)


def final_layernorm(x, ab):
    B, S, D = x.shape
    rows = B * S
    tm = _tile(rows)
    est = 2 * tm * D * 4 * 2 + 3 * tm * D * 4
    out = pl.pallas_call(
        layernorm_kernel,
        out_shape=jax.ShapeDtypeStruct((rows, D), x.dtype),
        grid=(rows // tm,),
        in_specs=[
            pl.BlockSpec(memory_space=pltpu.MemorySpace.SMEM),
            pl.BlockSpec((tm, D), lambda i: (i, 0)),
        ],
        out_specs=pl.BlockSpec((tm, D), lambda i: (i, 0)),
        compiler_params=_compiler_params(("parallel",), est),
    )(ab, x.reshape(rows, D))
    return out.reshape(B, S, D)


# ----------------------------- Encoder forward --------------------------------
def encoder_forward(params, x, mask, n_heads):
    B, S = x.shape[0], x.shape[1]
    # key-padding mask (B,1,1,S), 1=keep / 0=mask  ->  additive bias (B,1,S), once
    mask_bias = jnp.where(mask.reshape(B, 1, S) > 0, 0.0, NEG_INF).astype(jnp.float32)
    for p in params["layers"]:
        qkv_hm = qkv_projection(x, p, n_heads)          # LN1 + QKV, head-major layout
        ctx_hm = attention(qkv_hm, mask_bias, n_heads)  # masked softmax attention
        x = o_proj_ffn(x, ctx_hm, p, n_heads)           # O-proj + res + LN2 + FFN + res
    return final_layernorm(x, params["norm"])


# --------------------------- deterministic init -------------------------------
def init_encoder_params(key, n_layers, d_model, n_heads, d_ff):
    def linear_init(k, fan_in, fan_out):
        kw, kb = jax.random.split(k)
        lim = 1.0 / math.sqrt(fan_in)
        w = jax.random.uniform(kw, (fan_in, fan_out), jnp.float32, -lim, lim)
        b = jax.random.uniform(kb, (fan_out,), jnp.float32, -lim, lim)
        return w, b

    layers = []
    for lk in jax.random.split(key, n_layers):
        ks = jax.random.split(lk, 6)
        wq, bq = linear_init(ks[0], d_model, d_model)
        wk, bk = linear_init(ks[1], d_model, d_model)
        wv, bv = linear_init(ks[2], d_model, d_model)
        wo, bo = linear_init(ks[3], d_model, d_model)
        w1, b1 = linear_init(ks[4], d_model, d_ff)
        w2, b2 = linear_init(ks[5], d_ff, d_model)
        layers.append(dict(
            # fused QKV weight; matmul weights stored bf16 (MXU), biases stay f32
            wqkv=jnp.concatenate([wq, wk, wv], axis=1).astype(jnp.bfloat16),
            bqkv=jnp.concatenate([bq, bk, bv]).reshape(1, 3 * d_model),
            wo=wo.astype(jnp.bfloat16), bo=bo.reshape(1, d_model),
            w1=w1.astype(jnp.bfloat16), b1=b1.reshape(1, d_ff),
            w2=w2.astype(jnp.bfloat16), b2=b2.reshape(1, d_model),
            ln1=jnp.array([1.0, 0.0], jnp.float32),   # (alpha, bias) scalars
            ln2=jnp.array([1.0, 0.0], jnp.float32),
        ))
    return dict(
        layers=layers,
        norm=jnp.array([1.0, 0.0], jnp.float32),      # Encoder.norm (final LayerNorm)
    )


# --------------------------------- main ----------------------------------------
if __name__ == "__main__":
    B, S, D, H, FF, L = 2, 8, 32, 4, 64, 2
    key = jax.random.PRNGKey(0)
    kx, kp = jax.random.split(key)

    x = jax.random.normal(kx, (B, S, D), jnp.float32)
    # key-padding mask: batch 1 has its last 2 positions masked out
    mask = jnp.ones((B, 1, 1, S), jnp.float32).at[1, 0, 0, 6:].set(0.0)
    params = init_encoder_params(kp, L, D, H, FF)

    fwd = jax.jit(lambda p_, x_, m_: encoder_forward(p_, x_, m_, H))
    out = jax.block_until_ready(fwd(params, x, mask))

    assert out.shape == (B, S, D)
    assert bool(jnp.all(jnp.isfinite(out)))
    print("KERNEL_OK")
</pallas_src>

<mosaic_0001>
module attributes {stable_mosaic.version = 11 : i64} {
  func.func @attention_kernel(%arg0: i32, %arg1: i32, %arg2: i32, %arg3: memref<1x1x8xf32, #tpu.memory_space<vmem>>, %arg4: memref<1x1x8x8xbf16, #tpu.memory_space<vmem>>, %arg5: memref<1x1x8x8xbf16, #tpu.memory_space<vmem>>, %arg6: memref<1x1x8x8xbf16, #tpu.memory_space<vmem>>, %arg7: memref<1x1x8x8xbf16, #tpu.memory_space<vmem>>) attributes {dimension_semantics = [#tpu.dimension_semantics<parallel>, #tpu.dimension_semantics<parallel>, #tpu.dimension_semantics<parallel>], iteration_bounds = array<i64: 2, 4, 1>, scalar_prefetch = 0 : i64, scratch_operands = 0 : i64, tpu.core_type = #tpu.core_type<tc>, window_params = [{transform_indices = @transform_0, window_bounds = array<i64: 1, 1, 8>}, {transform_indices = @transform_1, window_bounds = array<i64: 1, 1, 8, 8>}, {transform_indices = @transform_2, window_bounds = array<i64: 1, 1, 8, 8>}, {transform_indices = @transform_3, window_bounds = array<i64: 1, 1, 8, 8>}, {transform_indices = @transform_4, window_bounds = array<i64: 1, 1, 8, 8>}]} {
    %c0 = arith.constant 0 : index
    %c0_0 = arith.constant 0 : index
    %c0_1 = arith.constant 0 : index
    %c0_2 = arith.constant 0 : index
    %0 = vector.load %arg4[%c0, %c0_0, %c0_1, %c0_2] : memref<1x1x8x8xbf16, #tpu.memory_space<vmem>>, vector<1x1x8x8xbf16>
    %1 = vector.shape_cast %0 : vector<1x1x8x8xbf16> to vector<8x8xbf16>
    %c0_3 = arith.constant 0 : index
    %c0_4 = arith.constant 0 : index
    %c0_5 = arith.constant 0 : index
    %c0_6 = arith.constant 0 : index
    %2 = vector.load %arg5[%c0_3, %c0_4, %c0_5, %c0_6] : memref<1x1x8x8xbf16, #tpu.memory_space<vmem>>, vector<1x1x8x8xbf16>
    %3 = vector.shape_cast %2 : vector<1x1x8x8xbf16> to vector<8x8xbf16>
    %c0_7 = arith.constant 0 : index
    %c0_8 = arith.constant 0 : index
    %c0_9 = arith.constant 0 : index
    %c0_10 = arith.constant 0 : index
    %4 = vector.load %arg6[%c0_7, %c0_8, %c0_9, %c0_10] : memref<1x1x8x8xbf16, #tpu.memory_space<vmem>>, vector<1x1x8x8xbf16>
    %5 = vector.shape_cast %4 : vector<1x1x8x8xbf16> to vector<8x8xbf16>
    %cst = arith.constant dense<0.000000e+00> : vector<8x8xf32>
    %6 = tpu.matmul %1, %3, %cst {dimension_numbers = #tpu.dot_dimension_numbers<[1], [1], [0], [0], [0, 0, 1, 0], [], []>} : vector<8x8xbf16>, vector<8x8xbf16>, vector<8x8xf32> -> vector<8x8xf32>
    %cst_11 = arith.constant 0.353553385 : f32
    %7 = vector.broadcast %cst_11 : f32 to vector<8x8xf32>
    %8 = arith.mulf %6, %7 : vector<8x8xf32>
    %c0_12 = arith.constant 0 : index
    %c0_13 = arith.constant 0 : index
    %c0_14 = arith.constant 0 : index
    %9 = vector.load %arg3[%c0_12, %c0_13, %c0_14] : memref<1x1x8xf32, #tpu.memory_space<vmem>>, vector<1x1x8xf32>
    %10 = vector.shape_cast %9 : vector<1x1x8xf32> to vector<1x8xf32>
    %11 = vector.broadcast %10 : vector<1x8xf32> to vector<8x8xf32>
    %12 = arith.addf %8, %11 : vector<8x8xf32>
    %cst_15 = arith.constant dense<0xFF800000> : vector<8xf32>
    %13 = vector.multi_reduction <maximumf>, %12, %cst_15 [1] : vector<8x8xf32> to vector<8xf32>
    %14 = vector.shape_cast %13 : vector<8xf32> to vector<8x1xf32>
    %15 = vector.broadcast %14 : vector<8x1xf32> to vector<8x8xf32>
    %16 = arith.subf %12, %15 : vector<8x8xf32>
    %17 = math.exp %16 : vector<8x8xf32>
    %cst_16 = arith.constant dense<0.000000e+00> : vector<8xf32>
    %18 = vector.multi_reduction <add>, %17, %cst_16 [1] : vector<8x8xf32> to vector<8xf32>
    %19 = vector.shape_cast %18 : vector<8xf32> to vector<8x1xf32>
    %20 = arith.truncf %17 : vector<8x8xf32> to vector<8x8xbf16>
    %cst_17 = arith.constant dense<0.000000e+00> : vector<8x8xf32>
    %21 = tpu.matmul %20, %5, %cst_17 {dimension_numbers = #tpu.dot_dimension_numbers<[1], [0], [0], [1], [0, 0, 1, 1], [], []>} : vector<8x8xbf16>, vector<8x8xbf16>, vector<8x8xf32> -> vector<8x8xf32>
    %22 = tpu.reciprocal %19 {approx = true} : vector<8x1xf32> -> vector<8x1xf32>
    %23 = vector.broadcast %22 : vector<8x1xf32> to vector<8x8xf32>
    %24 = arith.mulf %21, %23 : vector<8x8xf32>
    %25 = arith.truncf %24 : vector<8x8xf32> to vector<8x8xbf16>
    %c0_18 = arith.constant 0 : index
    %c0_19 = arith.constant 0 : index
    %c0_20 = arith.constant 0 : index
    %c0_21 = arith.constant 0 : index
    %26 = vector.load %arg7[%c0_18, %c0_19, %c0_20, %c0_21] : memref<1x1x8x8xbf16, #tpu.memory_space<vmem>>, vector<1x1x8x8xbf16>
    %27 = vector.shape_cast %26 : vector<1x1x8x8xbf16> to vector<8x8xbf16>
    %28 = vector.shape_cast %25 : vector<8x8xbf16> to vector<1x1x8x8xbf16>
    tpu.vector_store %arg7[%c0_18, %c0_19, %c0_20, %c0_21], %28 {strides = array<i32>} : memref<1x1x8x8xbf16, #tpu.memory_space<vmem>>, vector<1x1x8x8xbf16>,
    return
  }
  func.func @transform_0(%arg0: i32, %arg1: i32, %arg2: i32) -> (i32, i32, i32) {
    %c0_i32 = arith.constant 0 : i32
    %c0_i32_0 = arith.constant 0 : i32
    %c0_i32_1 = arith.constant 0 : i32
    return %arg0, %c0_i32, %c0_i32_0 : i32, i32, i32
  }
  func.func @transform_1(%arg0: i32, %arg1: i32, %arg2: i32) -> (i32, i32, i32, i32) {
    %c0_i32 = arith.constant 0 : i32
    %c0_i32_0 = arith.constant 0 : i32
    return %arg0, %arg1, %arg2, %c0_i32 : i32, i32, i32, i32
  }
  func.func @transform_2(%arg0: i32, %arg1: i32, %arg2: i32) -> (i32, i32, i32, i32) {
    %c4_i32 = arith.constant 4 : i32
    %0 = arith.addi %c4_i32, %arg1 : i32
    %c0_i32 = arith.constant 0 : i32
    %c0_i32_0 = arith.constant 0 : i32
    %c0_i32_1 = arith.constant 0 : i32
    return %arg0, %0, %c0_i32, %c0_i32_0 : i32, i32, i32, i32
  }
  func.func @transform_3(%arg0: i32, %arg1: i32, %arg2: i32) -> (i32, i32, i32, i32) {
    %c8_i32 = arith.constant 8 : i32
    %0 = arith.addi %c8_i32, %arg1 : i32
    %c0_i32 = arith.constant 0 : i32
    %c0_i32_0 = arith.constant 0 : i32
    %c0_i32_1 = arith.constant 0 : i32
    return %arg0, %0, %c0_i32, %c0_i32_0 : i32, i32, i32, i32
  }
  func.func @transform_4(%arg0: i32, %arg1: i32, %arg2: i32) -> (i32, i32, i32, i32) {
    %c0_i32 = arith.constant 0 : i32
    %c0_i32_0 = arith.constant 0 : i32
    return %arg0, %arg1, %arg2, %c0_i32 : i32, i32, i32, i32
  }
}

module attributes {stable_mosaic.version = 11 : i64} {
  func.func @qkv_proj_kernel(%arg0: i32, %arg1: i32, %arg2: memref<2xf32, #tpu.memory_space<smem>>, %arg3: memref<1x8x32xf32, #tpu.memory_space<vmem>>, %arg4: memref<32x96xbf16, #tpu.memory_space<vmem>>, %arg5: memref<1x96xf32, #tpu.memory_space<vmem>>, %arg6: memref<1x12x8x8xbf16, #tpu.memory_space<vmem>>) attributes {dimension_semantics = [#tpu.dimension_semantics<parallel>, #tpu.dimension_semantics<parallel>], iteration_bounds = array<i64: 2, 1>, scalar_prefetch = 0 : i64, scratch_operands = 0 : i64, tpu.core_type = #tpu.core_type<tc>, window_params = [{transform_indices = @transform_0, window_bounds = array<i64: 2>}, {transform_indices = @transform_1, window_bounds = array<i64: 1, 8, 32>}, {pipeline_mode = #tpu.pipeline_mode<synchronous>, transform_indices = @transform_2, window_bounds = array<i64: 32, 96>}, {pipeline_mode = #tpu.pipeline_mode<synchronous>, transform_indices = @transform_3, window_bounds = array<i64: 1, 96>}, {transform_indices = @transform_4, window_bounds = array<i64: 1, 12, 8, 8>}]} {
    %c0 = arith.constant 0 : index
    %c0_0 = arith.constant 0 : index
    %c0_1 = arith.constant 0 : index
    %0 = vector.load %arg3[%c0, %c0_0, %c0_1] : memref<1x8x32xf32, #tpu.memory_space<vmem>>, vector<1x8x32xf32>
    %1 = vector.shape_cast %0 : vector<1x8x32xf32> to vector<8x32xf32>
    %c0_2 = arith.constant 0 : index
    %2 = memref.load %arg2[%c0_2] : memref<2xf32, #tpu.memory_space<smem>>
    %c1 = arith.constant 1 : index
    %3 = memref.load %arg2[%c1] : memref<2xf32, #tpu.memory_space<smem>>
    %cst = arith.constant dense<0.000000e+00> : vector<8xf32>
    %4 = vector.multi_reduction <add>, %1, %cst [1] : vector<8x32xf32> to vector<8xf32>
    %5 = vector.shape_cast %4 : vector<8xf32> to vector<8x1xf32>
    %cst_3 = arith.constant 3.200000e+01 : f32
    %6 = vector.broadcast %cst_3 : f32 to vector<8x1xf32>
    %7 = arith.divf %5, %6 : vector<8x1xf32>
    %8 = vector.broadcast %7 : vector<8x1xf32> to vector<8x32xf32>
    %9 = arith.subf %1, %8 : vector<8x32xf32>
    %10 = arith.mulf %9, %9 : vector<8x32xf32>
    %cst_4 = arith.constant dense<0.000000e+00> : vector<8xf32>
    %11 = vector.multi_reduction <add>, %10, %cst_4 [1] : vector<8x32xf32> to vector<8xf32>
    %12 = vector.shape_cast %11 : vector<8xf32> to vector<8x1xf32>
    %cst_5 = arith.constant 3.100000e+01 : f32
    %13 = vector.broadcast %cst_5 : f32 to vector<8x1xf32>
    %14 = arith.divf %12, %13 : vector<8x1xf32>
    %15 = math.sqrt %14 : vector<8x1xf32>
    %cst_6 = arith.constant 9.99999997E-7 : f32
    %16 = vector.broadcast %cst_6 : f32 to vector<8x1xf32>
    %17 = arith.addf %15, %16 : vector<8x1xf32>
    %18 = tpu.reciprocal %17 {approx = true} : vector<8x1xf32> -> vector<8x1xf32>
    %19 = vector.broadcast %2 : f32 to vector<8x32xf32>
    %20 = arith.mulf %19, %9 : vector<8x32xf32>
    %21 = vector.broadcast %18 : vector<8x1xf32> to vector<8x32xf32>
    %22 = arith.mulf %20, %21 : vector<8x32xf32>
    %23 = vector.broadcast %3 : f32 to vector<8x32xf32>
    %24 = arith.addf %22, %23 : vector<8x32xf32>
    %25 = arith.truncf %24 : vector<8x32xf32> to vector<8x32xbf16>
    %c0_7 = arith.constant 0 : index
    %c0_8 = arith.constant 0 : index
    %26 = vector.load %arg4[%c0_7, %c0_8] : memref<32x96xbf16, #tpu.memory_space<vmem>>, vector<32x96xbf16>
    %cst_9 = arith.constant dense<0.000000e+00> : vector<8x96xf32>
    %27 = tpu.matmul %25, %26, %cst_9 {dimension_numbers = #tpu.dot_dimension_numbers<[1], [0], [0], [1], [0, 0, 1, 1], [], []>} : vector<8x32xbf16>, vector<32x96xbf16>, vector<8x96xf32> -> vector<8x96xf32>
    %c0_10 = arith.constant 0 : index
    %c0_11 = arith.constant 0 : index
    %28 = vector.load %arg5[%c0_10, %c0_11] : memref<1x96xf32, #tpu.memory_space<vmem>>, vector<1x96xf32>
    %29 = vector.broadcast %28 : vector<1x96xf32> to vector<8x96xf32>
    %30 = arith.addf %27, %29 : vector<8x96xf32>
    %31 = arith.truncf %30 : vector<8x96xf32> to vector<8x96xbf16>
    %32 = vector.extract_strided_slice %31 {offsets = [0, 0], sizes = [8, 8], strides = [1, 1]} : vector<8x96xbf16> to vector<8x8xbf16>
    %c0_12 = arith.constant 0 : index
    %c0_13 = arith.constant 0 : index
    %c0_14 = arith.constant 0 : index
    %c0_15 = arith.constant 0 : index
    %33 = vector.load %arg6[%c0_12, %c0_13, %c0_14, %c0_15] : memref<1x12x8x8xbf16, #tpu.memory_space<vmem>>, vector<1x1x8x8xbf16>
    %34 = vector.shape_cast %33 : vector<1x1x8x8xbf16> to vector<8x8xbf16>
    %35 = vector.shape_cast %32 : vector<8x8xbf16> to vector<1x1x8x8xbf16>
    tpu.vector_store %arg6[%c0_12, %c0_13, %c0_14, %c0_15], %35 {strides = array<i32>} : memref<1x12x8x8xbf16, #tpu.memory_space<vmem>>, vector<1x1x8x8xbf16>,
    %36 = vector.extract_strided_slice %31 {offsets = [0, 8], sizes = [8, 8], strides = [1, 1]} : vector<8x96xbf16> to vector<8x8xbf16>
    %c0_16 = arith.constant 0 : index
    %c1_17 = arith.constant 1 : index
    %c0_18 = arith.constant 0 : index
    %c0_19 = arith.constant 0 : index
    %37 = vector.load %arg6[%c0_16, %c1_17, %c0_18, %c0_19] : memref<1x12x8x8xbf16, #tpu.memory_space<vmem>>, vector<1x1x8x8xbf16>
    %38 = vector.shape_cast %37 : vector<1x1x8x8xbf16> to vector<8x8xbf16>
    %39 = vector.shape_cast %36 : vector<8x8xbf16> to vector<1x1x8x8xbf16>
    tpu.vector_store %arg6[%c0_16, %c1_17, %c0_18, %c0_19], %39 {strides = array<i32>} : memref<1x12x8x8xbf16, #tpu.memory_space<vmem>>, vector<1x1x8x8xbf16>,
    %40 = vector.extract_strided_slice %31 {offsets = [0, 16], sizes = [8, 8], strides = [1, 1]} : vector<8x96xbf16> to vector<8x8xbf16>
    %c0_20 = arith.constant 0 : index
    %c2 = arith.constant 2 : index
    %c0_21 = arith.constant 0 : index
    %c0_22 = arith.constant 0 : index
    %41 = vector.load %arg6[%c0_20, %c2, %c0_21, %c0_22] : memref<1x12x8x8xbf16, #tpu.memory_space<vmem>>, vector<1x1x8x8xbf16>
    %42 = vector.shape_cast %41 : vector<1x1x8x8xbf16> to vector<8x8xbf16>
    %43 = vector.shape_cast %40 : vector<8x8xbf16> to vector<1x1x8x8xbf16>
    tpu.vector_store %arg6[%c0_20, %c2, %c0_21, %c0_22], %43 {strides = array<i32>} : memref<1x12x8x8xbf16, #tpu.memory_space<vmem>>, vector<1x1x8x8xbf16>,
    %44 = vector.extract_strided_slice %31 {offsets = [0, 24], sizes = [8, 8], strides = [1, 1]} : vector<8x96xbf16> to vector<8x8xbf16>
    %c0_23 = arith.constant 0 : index
    %c3 = arith.constant 3 : index
    %c0_24 = arith.constant 0 : index
    %c0_25 = arith.constant 0 : index
    %45 = vector.load %arg6[%c0_23, %c3, %c0_24, %c0_25] : memref<1x12x8x8xbf16, #tpu.memory_space<vmem>>, vector<1x1x8x8xbf16>
    %46 = vector.shape_cast %45 : vector<1x1x8x8xbf16> to vector<8x8xbf16>
    %47 = vector.shape_cast %44 : vector<8x8xbf16> to vector<1x1x8x8xbf16>
    tpu.vector_store %arg6[%c0_23, %c3, %c0_24, %c0_25], %47 {strides = array<i32>} : memref<1x12x8x8xbf16, #tpu.memory_space<vmem>>, vector<1x1x8x8xbf16>,
    %48 = vector.extract_strided_slice %31 {offsets = [0, 32], sizes = [8, 8], strides = [1, 1]} : vector<8x96xbf16> to vector<8x8xbf16>
    %c0_26 = arith.constant 0 : index
    %c4 = arith.constant 4 : index
    %c0_27 = arith.constant 0 : index
    %c0_28 = arith.constant 0 : index
    %49 = vector.load %arg6[%c0_26, %c4, %c0_27, %c0_28] : memref<1x12x8x8xbf16, #tpu.memory_space<vmem>>, vector<1x1x8x8xbf16>
    %50 = vector.shape_cast %49 : vector<1x1x8x8xbf16> to vector<8x8xbf16>
    %51 = vector.shape_cast %48 : vector<8x8xbf16> to vector<1x1x8x8xbf16>
    tpu.vector_store %arg6[%c0_26, %c4, %c0_27, %c0_28], %51 {strides = array<i32>} : memref<1x12x8x8xbf16, #tpu.memory_space<vmem>>, vector<1x1x8x8xbf16>,
    %52 = vector.extract_strided_slice %31 {offsets = [0, 40], sizes = [8, 8], strides = [1, 1]} : vector<8x96xbf16> to vector<8x8xbf16>
    %c0_29 = arith.constant 0 : index
    %c5 = arith.constant 5 : index
    %c0_30 = arith.constant 0 : index
    %c0_31 = arith.constant 0 : index
    %53 = vector.load %arg6[%c0_29, %c5, %c0_30, %c0_31] : memref<1x12x8x8xbf16, #tpu.memory_space<vmem>>, vector<1x1x8x8xbf16>
    %54 = vector.shape_cast %53 : vector<1x1x8x8xbf16> to vector<8x8xbf16>
    %55 = vector.shape_cast %52 : vector<8x8xbf16> to vector<1x1x8x8xbf16>
    tpu.vector_store %arg6[%c0_29, %c5, %c0_30, %c0_31], %55 {strides = array<i32>} : memref<1x12x8x8xbf16, #tpu.memory_space<vmem>>, vector<1x1x8x8xbf16>,
    %56 = vector.extract_strided_slice %31 {offsets = [0, 48], sizes = [8, 8], strides = [1, 1]} : vector<8x96xbf16> to vector<8x8xbf16>
    %c0_32 = arith.constant 0 : index
    %c6 = arith.constant 6 : index
    %c0_33 = arith.constant 0 : index
    %c0_34 = arith.constant 0 : index
    %57 = vector.load %arg6[%c0_32, %c6, %c0_33, %c0_34] : memref<1x12x8x8xbf16, #tpu.memory_space<vmem>>, vector<1x1x8x8xbf16>
    %58 = vector.shape_cast %57 : vector<1x1x8x8xbf16> to vector<8x8xbf16>
    %59 = vector.shape_cast %56 : vector<8x8xbf16> to vector<1x1x8x8xbf16>
    tpu.vector_store %arg6[%c0_32, %c6, %c0_33, %c0_34], %59 {strides = array<i32>} : memref<1x12x8x8xbf16, #tpu.memory_space<vmem>>, vector<1x1x8x8xbf16>,
    %60 = vector.extract_strided_slice %31 {offsets = [0, 56], sizes = [8, 8], strides = [1, 1]} : vector<8x96xbf16> to vector<8x8xbf16>
    %c0_35 = arith.constant 0 : index
    %c7 = arith.constant 7 : index
    %c0_36 = arith.constant 0 : index
    %c0_37 = arith.constant 0 : index
    %61 = vector.load %arg6[%c0_35, %c7, %c0_36, %c0_37] : memref<1x12x8x8xbf16, #tpu.memory_space<vmem>>, vector<1x1x8x8xbf16>
    %62 = vector.shape_cast %61 : vector<1x1x8x8xbf16> to vector<8x8xbf16>
    %63 = vector.shape_cast %60 : vector<8x8xbf16> to vector<1x1x8x8xbf16>
    tpu.vector_store %arg6[%c0_35, %c7, %c0_36, %c0_37], %63 {strides = array<i32>} : memref<1x12x8x8xbf16, #tpu.memory_space<vmem>>, vector<1x1x8x8xbf16>,
    %64 = vector.extract_strided_slice %31 {offsets = [0, 64], sizes = [8, 8], strides = [1, 1]} : vector<8x96xbf16> to vector<8x8xbf16>
    %c0_38 = arith.constant 0 : index
    %c8 = arith.constant 8 : index
    %c0_39 = arith.constant 0 : index
    %c0_40 = arith.constant 0 : index
    %65 = vector.load %arg6[%c0_38, %c8, %c0_39, %c0_40] : memref<1x12x8x8xbf16, #tpu.memory_space<vmem>>, vector<1x1x8x8xbf16>
    %66 = vector.shape_cast %65 : vector<1x1x8x8xbf16> to vector<8x8xbf16>
    %67 = vector.shape_cast %64 : vector<8x8xbf16> to vector<1x1x8x8xbf16>
    tpu.vector_store %arg6[%c0_38, %c8, %c0_39, %c0_40], %67 {strides = array<i32>} : memref<1x12x8x8xbf16, #tpu.memory_space<vmem>>, vector<1x1x8x8xbf16>,
    %68 = vector.extract_strided_slice %31 {offsets = [0, 72], sizes = [8, 8], strides = [1, 1]} : vector<8x96xbf16> to vector<8x8xbf16>
    %c0_41 = arith.constant 0 : index
    %c9 = arith.constant 9 : index
    %c0_42 = arith.constant 0 : index
    %c0_43 = arith.constant 0 : index
    %69 = vector.load %arg6[%c0_41, %c9, %c0_42, %c0_43] : memref<1x12x8x8xbf16, #tpu.memory_space<vmem>>, vector<1x1x8x8xbf16>
    %70 = vector.shape_cast %69 : vector<1x1x8x8xbf16> to vector<8x8xbf16>
    %71 = vector.shape_cast %68 : vector<8x8xbf16> to vector<1x1x8x8xbf16>
    tpu.vector_store %arg6[%c0_41, %c9, %c0_42, %c0_43], %71 {strides = array<i32>} : memref<1x12x8x8xbf16, #tpu.memory_space<vmem>>, vector<1x1x8x8xbf16>,
    %72 = vector.extract_strided_slice %31 {offsets = [0, 80], sizes = [8, 8], strides = [1, 1]} : vector<8x96xbf16> to vector<8x8xbf16>
    %c0_44 = arith.constant 0 : index
    %c10 = arith.constant 10 : index
    %c0_45 = arith.constant 0 : index
    %c0_46 = arith.constant 0 : index
    %73 = vector.load %arg6[%c0_44, %c10, %c0_45, %c0_46] : memref<1x12x8x8xbf16, #tpu.memory_space<vmem>>, vector<1x1x8x8xbf16>
    %74 = vector.shape_cast %73 : vector<1x1x8x8xbf16> to vector<8x8xbf16>
    %75 = vector.shape_cast %72 : vector<8x8xbf16> to vector<1x1x8x8xbf16>
    tpu.vector_store %arg6[%c0_44, %c10, %c0_45, %c0_46], %75 {strides = array<i32>} : memref<1x12x8x8xbf16, #tpu.memory_space<vmem>>, vector<1x1x8x8xbf16>,
    %76 = vector.extract_strided_slice %31 {offsets = [0, 88], sizes = [8, 8], strides = [1, 1]} : vector<8x96xbf16> to vector<8x8xbf16>
    %c0_47 = arith.constant 0 : index
    %c11 = arith.constant 11 : index
    %c0_48 = arith.constant 0 : index
    %c0_49 = arith.constant 0 : index
    %77 = vector.load %arg6[%c0_47, %c11, %c0_48, %c0_49] : memref<1x12x8x8xbf16, #tpu.memory_space<vmem>>, vector<1x1x8x8xbf16>
    %78 = vector.shape_cast %77 : vector<1x1x8x8xbf16> to vector<8x8xbf16>
    %79 = vector.shape_cast %76 : vector<8x8xbf16> to vector<1x1x8x8xbf16>
    tpu.vector_store %arg6[%c0_47, %c11, %c0_48, %c0_49], %79 {strides = array<i32>} : memref<1x12x8x8xbf16, #tpu.memory_space<vmem>>, vector<1x1x8x8xbf16>,
    return
  }
  func.func @transform_0(%arg0: i32, %arg1: i32) -> i32 {
    %c0_i32 = arith.constant 0 : i32
    %c0_i32_0 = arith.constant 0 : i32
    return %c0_i32 : i32
  }
  func.func @transform_1(%arg0: i32, %arg1: i32) -> (i32, i32, i32) {
    %c0_i32 = arith.constant 0 : i32
    %c0_i32_0 = arith.constant 0 : i32
    return %arg0, %arg1, %c0_i32 : i32, i32, i32
  }
  func.func @transform_2(%arg0: i32, %arg1: i32) -> (i32, i32) {
    %c0_i32 = arith.constant 0 : i32
    %c0_i32_0 = arith.constant 0 : i32
    %c0_i32_1 = arith.constant 0 : i32
    return %c0_i32, %c0_i32_0 : i32, i32
  }
  func.func @transform_3(%arg0: i32, %arg1: i32) -> (i32, i32) {
    %c0_i32 = arith.constant 0 : i32
    %c0_i32_0 = arith.constant 0 : i32
    %c0_i32_1 = arith.constant 0 : i32
    return %c0_i32, %c0_i32_0 : i32, i32
  }
  func.func @transform_4(%arg0: i32, %arg1: i32) -> (i32, i32, i32, i32) {
    %c0_i32 = arith.constant 0 : i32
    %c0_i32_0 = arith.constant 0 : i32
    %c0_i32_1 = arith.constant 0 : i32
    return %arg0, %c0_i32, %arg1, %c0_i32_0 : i32, i32, i32, i32
  }
}

module attributes {stable_mosaic.version = 11 : i64} {
  func.func @o_ffn_kernel(%arg0: i32, %arg1: i32, %arg2: memref<2xf32, #tpu.memory_space<smem>>, %arg3: memref<1x8x32xf32, #tpu.memory_space<vmem>>, %arg4: memref<1x4x8x8xbf16, #tpu.memory_space<vmem>>, %arg5: memref<32x32xbf16, #tpu.memory_space<vmem>>, %arg6: memref<1x32xf32, #tpu.memory_space<vmem>>, %arg7: memref<32x64xbf16, #tpu.memory_space<vmem>>, %arg8: memref<1x64xf32, #tpu.memory_space<vmem>>, %arg9: memref<64x32xbf16, #tpu.memory_space<vmem>>, %arg10: memref<1x32xf32, #tpu.memory_space<vmem>>, %arg11: memref<1x8x32xf32, #tpu.memory_space<vmem>>) attributes {dimension_semantics = [#tpu.dimension_semantics<parallel>, #tpu.dimension_semantics<parallel>], iteration_bounds = array<i64: 2, 1>, scalar_prefetch = 0 : i64, scratch_operands = 0 : i64, tpu.core_type = #tpu.core_type<tc>, window_params = [{transform_indices = @transform_0, window_bounds = array<i64: 2>}, {transform_indices = @transform_1, window_bounds = array<i64: 1, 8, 32>}, {transform_indices = @transform_2, window_bounds = array<i64: 1, 4, 8, 8>}, {pipeline_mode = #tpu.pipeline_mode<synchronous>, transform_indices = @transform_3, window_bounds = array<i64: 32, 32>}, {pipeline_mode = #tpu.pipeline_mode<synchronous>, transform_indices = @transform_4, window_bounds = array<i64: 1, 32>}, {pipeline_mode = #tpu.pipeline_mode<synchronous>, transform_indices = @transform_5, window_bounds = array<i64: 32, 64>}, {pipeline_mode = #tpu.pipeline_mode<synchronous>, transform_indices = @transform_6, window_bounds = array<i64: 1, 64>}, {pipeline_mode = #tpu.pipeline_mode<synchronous>, transform_indices = @transform_7, window_bounds = array<i64: 64, 32>}, {pipeline_mode = #tpu.pipeline_mode<synchronous>, transform_indices = @transform_8, window_bounds = array<i64: 1, 32>}, {transform_indices = @transform_9, window_bounds = array<i64: 1, 8, 32>}]} {
    %c0 = arith.constant 0 : index
    %c0_0 = arith.constant 0 : index
    %c0_1 = arith.constant 0 : index
    %0 = vector.load %arg3[%c0, %c0_0, %c0_1] : memref<1x8x32xf32, #tpu.memory_space<vmem>>, vector<1x8x32xf32>
    %1 = vector.shape_cast %0 : vector<1x8x32xf32> to vector<8x32xf32>
    %c0_2 = arith.constant 0 : index
    %c0_3 = arith.constant 0 : index
    %c0_4 = arith.constant 0 : index
    %c0_5 = arith.constant 0 : index
    %2 = vector.load %arg4[%c0_2, %c0_3, %c0_4, %c0_5] : memref<1x4x8x8xbf16, #tpu.memory_space<vmem>>, vector<1x1x8x8xbf16>
    %3 = vector.shape_cast %2 : vector<1x1x8x8xbf16> to vector<8x8xbf16>
    %c0_6 = arith.constant 0 : index
    %c1 = arith.constant 1 : index
    %c0_7 = arith.constant 0 : index
    %c0_8 = arith.constant 0 : index
    %4 = vector.load %arg4[%c0_6, %c1, %c0_7, %c0_8] : memref<1x4x8x8xbf16, #tpu.memory_space<vmem>>, vector<1x1x8x8xbf16>
    %5 = vector.shape_cast %4 : vector<1x1x8x8xbf16> to vector<8x8xbf16>
    %c0_9 = arith.constant 0 : index
    %c2 = arith.constant 2 : index
    %c0_10 = arith.constant 0 : index
    %c0_11 = arith.constant 0 : index
    %6 = vector.load %arg4[%c0_9, %c2, %c0_10, %c0_11] : memref<1x4x8x8xbf16, #tpu.memory_space<vmem>>, vector<1x1x8x8xbf16>
    %7 = vector.shape_cast %6 : vector<1x1x8x8xbf16> to vector<8x8xbf16>
    %c0_12 = arith.constant 0 : index
    %c3 = arith.constant 3 : index
    %c0_13 = arith.constant 0 : index
    %c0_14 = arith.constant 0 : index
    %8 = vector.load %arg4[%c0_12, %c3, %c0_13, %c0_14] : memref<1x4x8x8xbf16, #tpu.memory_space<vmem>>, vector<1x1x8x8xbf16>
    %9 = vector.shape_cast %8 : vector<1x1x8x8xbf16> to vector<8x8xbf16>
    %10 = tpu.concatenate %3, %5, %7, %9 in 1 : vector<8x8xbf16>, vector<8x8xbf16>, vector<8x8xbf16>, vector<8x8xbf16> -> vector<8x32xbf16>
    %c0_15 = arith.constant 0 : index
    %c0_16 = arith.constant 0 : index
    %11 = vector.load %arg5[%c0_15, %c0_16] : memref<32x32xbf16, #tpu.memory_space<vmem>>, vector<32x32xbf16>
    %cst = arith.constant dense<0.000000e+00> : vector<8x32xf32>
    %12 = tpu.matmul %10, %11, %cst {dimension_numbers = #tpu.dot_dimension_numbers<[1], [0], [0], [1], [0, 0, 1, 1], [], []>} : vector<8x32xbf16>, vector<32x32xbf16>, vector<8x32xf32> -> vector<8x32xf32>
    %13 = arith.addf %1, %12 : vector<8x32xf32>
    %c0_17 = arith.constant 0 : index
    %c0_18 = arith.constant 0 : index
    %14 = vector.load %arg6[%c0_17, %c0_18] : memref<1x32xf32, #tpu.memory_space<vmem>>, vector<1x32xf32>
    %15 = vector.broadcast %14 : vector<1x32xf32> to vector<8x32xf32>
    %16 = arith.addf %13, %15 : vector<8x32xf32>
    %c0_19 = arith.constant 0 : index
    %17 = memref.load %arg2[%c0_19] : memref<2xf32, #tpu.memory_space<smem>>
    %c1_20 = arith.constant 1 : index
    %18 = memref.load %arg2[%c1_20] : memref<2xf32, #tpu.memory_space<smem>>
    %cst_21 = arith.constant dense<0.000000e+00> : vector<8xf32>
    %19 = vector.multi_reduction <add>, %16, %cst_21 [1] : vector<8x32xf32> to vector<8xf32>
    %20 = vector.shape_cast %19 : vector<8xf32> to vector<8x1xf32>
    %cst_22 = arith.constant 3.200000e+01 : f32
    %21 = vector.broadcast %cst_22 : f32 to vector<8x1xf32>
    %22 = arith.divf %20, %21 : vector<8x1xf32>
    %23 = vector.broadcast %22 : vector<8x1xf32> to vector<8x32xf32>
    %24 = arith.subf %16, %23 : vector<8x32xf32>
    %25 = arith.mulf %24, %24 : vector<8x32xf32>
    %cst_23 = arith.constant dense<0.000000e+00> : vector<8xf32>
    %26 = vector.multi_reduction <add>, %25, %cst_23 [1] : vector<8x32xf32> to vector<8xf32>
    %27 = vector.shape_cast %26 : vector<8xf32> to vector<8x1xf32>
    %cst_24 = arith.constant 3.100000e+01 : f32
    %28 = vector.broadcast %cst_24 : f32 to vector<8x1xf32>
    %29 = arith.divf %27, %28 : vector<8x1xf32>
    %30 = math.sqrt %29 : vector<8x1xf32>
    %cst_25 = arith.constant 9.99999997E-7 : f32
    %31 = vector.broadcast %cst_25 : f32 to vector<8x1xf32>
    %32 = arith.addf %30, %31 : vector<8x1xf32>
    %33 = tpu.reciprocal %32 {approx = true} : vector<8x1xf32> -> vector<8x1xf32>
    %34 = vector.broadcast %17 : f32 to vector<8x32xf32>
    %35 = arith.mulf %34, %24 : vector<8x32xf32>
    %36 = vector.broadcast %33 : vector<8x1xf32> to vector<8x32xf32>
    %37 = arith.mulf %35, %36 : vector<8x32xf32>
    %38 = vector.broadcast %18 : f32 to vector<8x32xf32>
    %39 = arith.addf %37, %38 : vector<8x32xf32>
    %40 = arith.truncf %39 : vector<8x32xf32> to vector<8x32xbf16>
    %c0_26 = arith.constant 0 : index
    %c0_27 = arith.constant 0 : index
    %41 = vector.load %arg7[%c0_26, %c0_27] : memref<32x64xbf16, #tpu.memory_space<vmem>>, vector<32x64xbf16>
    %cst_28 = arith.constant dense<0.000000e+00> : vector<8x64xf32>
    %42 = tpu.matmul %40, %41, %cst_28 {dimension_numbers = #tpu.dot_dimension_numbers<[1], [0], [0], [1], [0, 0, 1, 1], [], []>} : vector<8x32xbf16>, vector<32x64xbf16>, vector<8x64xf32> -> vector<8x64xf32>
    %c0_29 = arith.constant 0 : index
    %c0_30 = arith.constant 0 : index
    %43 = vector.load %arg8[%c0_29, %c0_30] : memref<1x64xf32, #tpu.memory_space<vmem>>, vector<1x64xf32>
    %44 = vector.broadcast %43 : vector<1x64xf32> to vector<8x64xf32>
    %45 = arith.addf %42, %44 : vector<8x64xf32>
    %cst_31 = arith.constant 0.000000e+00 : f32
    %46 = vector.broadcast %cst_31 : f32 to vector<8x64xf32>
    %47 = arith.maximumf %45, %46 : vector<8x64xf32>
    %48 = arith.truncf %47 : vector<8x64xf32> to vector<8x64xbf16>
    %c0_32 = arith.constant 0 : index
    %c0_33 = arith.constant 0 : index
    %49 = vector.load %arg9[%c0_32, %c0_33] : memref<64x32xbf16, #tpu.memory_space<vmem>>, vector<64x32xbf16>
    %cst_34 = arith.constant dense<0.000000e+00> : vector<8x32xf32>
    %50 = tpu.matmul %48, %49, %cst_34 {dimension_numbers = #tpu.dot_dimension_numbers<[1], [0], [0], [1], [0, 0, 1, 1], [], []>} : vector<8x64xbf16>, vector<64x32xbf16>, vector<8x32xf32> -> vector<8x32xf32>
    %c0_35 = arith.constant 0 : index
    %c0_36 = arith.constant 0 : index
    %51 = vector.load %arg10[%c0_35, %c0_36] : memref<1x32xf32, #tpu.memory_space<vmem>>, vector<1x32xf32>
    %52 = vector.broadcast %51 : vector<1x32xf32> to vector<8x32xf32>
    %53 = arith.addf %50, %52 : vector<8x32xf32>
    %54 = arith.addf %16, %53 : vector<8x32xf32>
    %c0_37 = arith.constant 0 : index
    %c0_38 = arith.constant 0 : index
    %c0_39 = arith.constant 0 : index
    %55 = vector.load %arg11[%c0_37, %c0_38, %c0_39] : memref<1x8x32xf32, #tpu.memory_space<vmem>>, vector<1x8x32xf32>
    %56 = vector.shape_cast %55 : vector<1x8x32xf32> to vector<8x32xf32>
    %57 = vector.shape_cast %54 : vector<8x32xf32> to vector<1x8x32xf32>
    tpu.vector_store %arg11[%c0_37, %c0_38, %c0_39], %57 {strides = array<i32>} : memref<1x8x32xf32, #tpu.memory_space<vmem>>, vector<1x8x32xf32>,
    return
  }
  func.func @transform_0(%arg0: i32, %arg1: i32) -> i32 {
    %c0_i32 = arith.constant 0 : i32
    %c0_i32_0 = arith.constant 0 : i32
    return %c0_i32 : i32
  }
  func.func @transform_1(%arg0: i32, %arg1: i32) -> (i32, i32, i32) {
    %c0_i32 = arith.constant 0 : i32
    %c0_i32_0 = arith.constant 0 : i32
    return %arg0, %arg1, %c0_i32 : i32, i32, i32
  }
  func.func @transform_2(%arg0: i32, %arg1: i32) -> (i32, i32, i32, i32) {
    %c0_i32 = arith.constant 0 : i32
    %c0_i32_0 = arith.constant 0 : i32
    %c0_i32_1 = arith.constant 0 : i32
    return %arg0, %c0_i32, %arg1, %c0_i32_0 : i32, i32, i32, i32
  }
  func.func @transform_3(%arg0: i32, %arg1: i32) -> (i32, i32) {
    %c0_i32 = arith.constant 0 : i32
    %c0_i32_0 = arith.constant 0 : i32
    %c0_i32_1 = arith.constant 0 : i32
    return %c0_i32, %c0_i32_0 : i32, i32
  }
  func.func @transform_4(%arg0: i32, %arg1: i32) -> (i32, i32) {
    %c0_i32 = arith.constant 0 : i32
    %c0_i32_0 = arith.constant 0 : i32
    %c0_i32_1 = arith.constant 0 : i32
    return %c0_i32, %c0_i32_0 : i32, i32
  }
  func.func @transform_5(%arg0: i32, %arg1: i32) -> (i32, i32) {
    %c0_i32 = arith.constant 0 : i32
    %c0_i32_0 = arith.constant 0 : i32
    %c0_i32_1 = arith.constant 0 : i32
    return %c0_i32, %c0_i32_0 : i32, i32
  }
  func.func @transform_6(%arg0: i32, %arg1: i32) -> (i32, i32) {
    %c0_i32 = arith.constant 0 : i32
    %c0_i32_0 = arith.constant 0 : i32
    %c0_i32_1 = arith.constant 0 : i32
    return %c0_i32, %c0_i32_0 : i32, i32
  }
  func.func @transform_7(%arg0: i32, %arg1: i32) -> (i32, i32) {
    %c0_i32 = arith.constant 0 : i32
    %c0_i32_0 = arith.constant 0 : i32
    %c0_i32_1 = arith.constant 0 : i32
    return %c0_i32, %c0_i32_0 : i32, i32
  }
  func.func @transform_8(%arg0: i32, %arg1: i32) -> (i32, i32) {
    %c0_i32 = arith.constant 0 : i32
    %c0_i32_0 = arith.constant 0 : i32
    %c0_i32_1 = arith.constant 0 : i32
    return %c0_i32, %c0_i32_0 : i32, i32
  }
  func.func @transform_9(%arg0: i32, %arg1: i32) -> (i32, i32, i32) {
    %c0_i32 = arith.constant 0 : i32
    %c0_i32_0 = arith.constant 0 : i32
    return %arg0, %arg1, %c0_i32 : i32, i32, i32
  }
}

module attributes {stable_mosaic.version = 11 : i64} {
  func.func @layernorm_kernel(%arg0: i32, %arg1: memref<2xf32, #tpu.memory_space<smem>>, %arg2: memref<16x32xf32, #tpu.memory_space<vmem>>, %arg3: memref<16x32xf32, #tpu.memory_space<vmem>>) attributes {dimension_semantics = [#tpu.dimension_semantics<parallel>], iteration_bounds = array<i64: 1>, scalar_prefetch = 0 : i64, scratch_operands = 0 : i64, tpu.core_type = #tpu.core_type<tc>, window_params = [{transform_indices = @transform_0, window_bounds = array<i64: 2>}, {transform_indices = @transform_1, window_bounds = array<i64: 16, 32>}, {transform_indices = @transform_2, window_bounds = array<i64: 16, 32>}]} {
    %c0 = arith.constant 0 : index
    %c0_0 = arith.constant 0 : index
    %0 = vector.load %arg2[%c0, %c0_0] : memref<16x32xf32, #tpu.memory_space<vmem>>, vector<16x32xf32>
    %c0_1 = arith.constant 0 : index
    %1 = memref.load %arg1[%c0_1] : memref<2xf32, #tpu.memory_space<smem>>
    %c1 = arith.constant 1 : index
    %2 = memref.load %arg1[%c1] : memref<2xf32, #tpu.memory_space<smem>>
    %cst = arith.constant dense<0.000000e+00> : vector<16xf32>
    %3 = vector.multi_reduction <add>, %0, %cst [1] : vector<16x32xf32> to vector<16xf32>
    %4 = vector.shape_cast %3 : vector<16xf32> to vector<16x1xf32>
    %cst_2 = arith.constant 3.200000e+01 : f32
    %5 = vector.broadcast %cst_2 : f32 to vector<16x1xf32>
    %6 = arith.divf %4, %5 : vector<16x1xf32>
    %7 = vector.broadcast %6 : vector<16x1xf32> to vector<16x32xf32>
    %8 = arith.subf %0, %7 : vector<16x32xf32>
    %9 = arith.mulf %8, %8 : vector<16x32xf32>
    %cst_3 = arith.constant dense<0.000000e+00> : vector<16xf32>
    %10 = vector.multi_reduction <add>, %9, %cst_3 [1] : vector<16x32xf32> to vector<16xf32>
    %11 = vector.shape_cast %10 : vector<16xf32> to vector<16x1xf32>
    %cst_4 = arith.constant 3.100000e+01 : f32
    %12 = vector.broadcast %cst_4 : f32 to vector<16x1xf32>
    %13 = arith.divf %11, %12 : vector<16x1xf32>
    %14 = math.sqrt %13 : vector<16x1xf32>
    %cst_5 = arith.constant 9.99999997E-7 : f32
    %15 = vector.broadcast %cst_5 : f32 to vector<16x1xf32>
    %16 = arith.addf %14, %15 : vector<16x1xf32>
    %17 = tpu.reciprocal %16 {approx = true} : vector<16x1xf32> -> vector<16x1xf32>
    %18 = vector.broadcast %1 : f32 to vector<16x32xf32>
    %19 = arith.mulf %18, %8 : vector<16x32xf32>
    %20 = vector.broadcast %17 : vector<16x1xf32> to vector<16x32xf32>
    %21 = arith.mulf %19, %20 : vector<16x32xf32>
    %22 = vector.broadcast %2 : f32 to vector<16x32xf32>
    %23 = arith.addf %21, %22 : vector<16x32xf32>
    %c0_6 = arith.constant 0 : index
    %c0_7 = arith.constant 0 : index
    %24 = vector.load %arg3[%c0_6, %c0_7] : memref<16x32xf32, #tpu.memory_space<vmem>>, vector<16x32xf32>
    tpu.vector_store %arg3[%c0_6, %c0_7], %23 {strides = array<i32>} : memref<16x32xf32, #tpu.memory_space<vmem>>, vector<16x32xf32>,
    return
  }
  func.func @transform_0(%arg0: i32) -> i32 {
    %c0_i32 = arith.constant 0 : i32
    %c0_i32_0 = arith.constant 0 : i32
    return %c0_i32 : i32
  }
  func.func @transform_1(%arg0: i32) -> (i32, i32) {
    %c0_i32 = arith.constant 0 : i32
    %c0_i32_0 = arith.constant 0 : i32
    return %arg0, %c0_i32 : i32, i32
  }
  func.func @transform_2(%arg0: i32) -> (i32, i32) {
    %c0_i32 = arith.constant 0 : i32
    %c0_i32_0 = arith.constant 0 : i32
    return %arg0, %c0_i32 : i32, i32
  }
}

</mosaic_0001>

<bundles_post_ra>
// kernel: _lambda_.8
= control target key start
LH: loop header
LB: loop body
LE: loop exit
PB: predicated region body
PF: predicated region fallthrough
CT: control target
= control target key end

     0   :  { %s759_s15 = smov 0   ;;  %s761_s16 = smov 0   ;;  %s837_s0 = inlined_call_operand.vmem [shape: f32[2,1,8], index: 0, kind: input, shape index: {}]   ;;  %s838_s1 = inlined_call_operand.vmem [shape: bf16[2,12,8,8], index: 1, kind: input, shape index: {}, may-alias: {1,2,3}]   ;;  %s839_s2 = inlined_call_operand.vmem [shape: bf16[2,12,8,8], index: 2, kind: input, shape index: {}, may-alias: {1,2,3}]   ;;  %s840_s3 = inlined_call_operand.vmem [shape: bf16[2,12,8,8], index: 3, kind: input, shape index: {}, may-alias: {1,2,3}]   ;;  %s841_s4 = inlined_call_operand.vmem [shape: bf16[2,4,8,8], index: 4, kind: output, shape index: {}]  }
   0x1   :  { %s763_s17 = smov 0   ;;  %s765_s18 = smov 0  }
   0x2   :  { %s767_s19 = smov 0  }
   0x3 LB: > { %s29_s20 = sadd.s32 1, %s722_s17  ;;  %s33_s21 = sadd.s32 1, %s726_s18  ;;  %s730_s19 = sphi %s767_s19, %s14_s19   ;;  %s726_s18 = sphi %s765_s18, %s845_s18   ;;  %s722_s17 = sphi %s763_s17, %s844_s17   ;;  %s718_s16 = sphi %s761_s16, %s843_s16   ;;  %s714_s15 = sphi %s759_s15, %s842_s15  }
   0x4   : > { %p31_p0 = scmp.ge.s32.totalorder %s29_s20, 4  ;;  %p618_p1 = scmp.ge.s32.totalorder %s730_s19, 1 }
   0x5   : > { %p241_p2 = scmp.lt.s32.totalorder %s730_s19, 9 }
   0x6   : > { %s847_s20 = smov (%p31_p0, %s29_s20), 0  ;;  %s849_s21 = smov (!%p31_p0, %s33_s21), %s726_s18 }
   0x7   : > { %p242_p3 = pnand %p618_p1, %p241_p2  ;;  %p35_p4 = scmp.ge.s32.totalorder %s849_s21, 2 }
   0x8   : > { %p300_p5 = scmp.lt.s32.totalorder (!%p242_p3), %s718_s16, 1  ;;  %s314_s22 = sadd.s32 (!%p242_p3), 4, %s714_s15 }
   0x9   : > { %s851_s21 = smov (%p35_p4, %s849_s21), 0  ;;  %245 = sbr.rel (%p242_p3) target bundleno = 584 (0x248), region = 36 }
   0xa   : > { %p317_p6 = scmp.lt.s32.totalorder (!%p242_p3), %s314_s22, 11  ;;  %p305_p7 = scmp.lt.s32.totalorder (!%p242_p3), %s714_s15, 11 }
   0xb   : > { %s324_s12 = sadd.s32 (!%p242_p3), 8, %s714_s15  ;;  %p336_p9 = scmp.lt.s32.totalorder (!%p242_p3), %s714_s15, 3 }
   0xc   : > { %p327_p8 = scmp.lt.s32.totalorder (!%p242_p3), %s324_s12, 11 }
   0xe   : > { %v732_v0 = vmov 0.0   ;;  %vm733_vm0 = vmmov 0   ;;  %s853_s16 = smov (!%p300_p5, %s718_s16), 1  ;;  %s855_s22 = smov (!%p317_p6, %s314_s22), 11  ;;  %vm349_vm1 = vcmask 64512   ;;  %vm418_vm2 = vcmask 1043456  }
   0xf   : > { %633 = vmatprep.subr.bf16.mxu0 %v732_v0  ;;  %635 = vmatprep.mubr.msk.bf16.mxu0 %vm733_vm0, %v732_v0  ;;  %s645_s23 = smul.u32 12, %s853_s16  ;;  %s302_s11 = scalar_lea.vmem %s837_s0, %s853_s16  ;;  %vm465_vm3 = vcmask 60416  }
  0x10   : > { %639 = vmatprep.subr.bf16.mxu1 %v732_v0  ;;  %641 = vmatprep.mubr.msk.bf16.mxu1 %vm733_vm0, %v732_v0  ;;  %s306_s24 = scalar_select %p305_p7, %s714_s15, 11  ;;  %v625_v5 = vld [vmem:[%s302_s11] ss:$0 sm:$0xff] }
  0x11   : > { %s320_s25 = sadd.s32 %s645_s23, %s855_s22  ;;  %s857_s12 = smov (!%p327_p8, %s324_s12), 11 }
  0x12   : > { %s620_s26 = sshll.u32 %s320_s25, 2  ;;  %s311_s27 = sadd.s32 %s645_s23, %s306_s24 }
  0x13   : > { %s322_s30 = scalar_lea.vmem %s839_s2, %s620_s26  ;;  %s619_s5 = sshll.u32 %s311_s27, 2 }
  0x14   : > { %v347_v1 = vld [vmem:[%s322_s30] sm:$0xf]  ;;  %s313_s8 = scalar_lea.vmem %s838_s1, %s619_s5  ;;  %s330_s13 = sadd.s32 %s645_s23, %s857_s12 }
  0x15   : > { %v354_v2 = vsel %vm349_vm1, %v347_v1, 0  ;;  %v346_v3 = vld [vmem:[%s313_s8] sm:$0xf]  ;;  %s621_s14 = sshll.u32 %s330_s13, 2  ;;  %s859_s15 = smov (!%p336_p9, %s714_s15), 3 }
  0x16   : > { %634 = vmatpush3.bf16.xpose.msra.mxu0 %v354_v2  ;;  %s332_s25 = scalar_lea.vmem %s840_s3, %s621_s14  ;;  %s622_s23 = sshll.u32 %s853_s16, 2 }
  0x17   : > { %v348_v12 = vld [vmem:[%s332_s25] sm:$0xf]  ;;  %s342_s26 = sadd.s32 %s622_s23, %s859_s15 }
  0x18   : > { %v420_v13 = vsel %vm418_vm2, %v348_v12, 0  ;;  %s623_s27 = sshll.u32 %s342_s26, 2 }
  0x19   : > { %640 = vmatpush3.bf16.msra.mxu1 %v420_v13  ;;  %s344_s30 = scalar_lea.vmem %s841_s4, %s623_s27 }
  0x1d   : > { %636 = vmatmul.mubr.msk.bf16.vlgmr.msra.gmra.mxu0 %vm349_vm1, %v346_v3 }
  0xdd   : > { %v390_v4 = vpop.f32.mrf.mxu0 }
  0xde   : > { %v396_v6 = vmul.f32 0.35355338, %v390_v4 }
  0xdf   : > { %v637_v7 = vpop.f32.mrf.mxu0 }
  0xe0   : > { %v404_v8 = vadd.f32 %v625_v5, %v396_v6 }
  0xe1   : > { %v393_v9 = vpop.f32.mrf.mxu0 }
  0xe2   : > { %v405_v10 = vsel %vm349_vm1, %v404_v8, -inf }
  0xe3   : > { %v638_v11 = vpop.f32.mrf.mxu0  ;;  %406 = vmax.xlane.f32.xlu0 %v405_v10 }
 0x16c   : > { %v407_v14 = vpop.xlane.xlu0 %406 }
 0x16d   : > { %v408_v15 = vsub.f32 %v404_v8, %v407_v14 }
 0x16f   : > { %v409_v16 = vmul.f32 1.442695, %v408_v15 }
 0x171   : > { %688 = vpow2.f32 %v409_v16 }
 0x17e   : > { %v689_v17 = vpop.eup %688 }
 0x17f   : > { %v411_v18 = vsel %vm349_vm1, %v689_v17, 0.0  ;;  %v414_v19 = vpack.c.bf16 %v689_v17, %v689_v17 }
 0x180   : > { %412 = vadd.xlane.f32.xlu0 %v411_v18 }
 0x181   : > { %642 = vmatmul.mubr.msk.bf16.vlgmr.msra.gmra.mxu1 %vm349_vm1, %v414_v19 }
 0x209   : > { %v413_v20 = vpop.xlane.xlu0 %412 }
 0x20a   : > { %690 = vrcp.f32 %v413_v20 }
 0x217   : > { %v691_v21 = vpop.eup %690 }
 0x241   : > { %v456_v22 = vpop.f32.mrf.mxu1 }
 0x242   : > { %v463_v23 = vmul.f32 %v691_v21, %v456_v22 }
 0x243   : > { %v643_v24 = vpop.f32.mrf.mxu1 }
 0x244   : > { %v464_v25 = vpack.c.bf16 %v463_v23, %v463_v23 }
 0x245   : > { %v459_v26 = vpop.f32.mrf.mxu1 }
 0x246   : > { %466 = vst.msk [vmem:[%s344_s30] sm:$0xf] %vm465_vm3, %v464_v25 }
 0x247   : > { %v644_v27 = vpop.f32.mrf.mxu1 }
 0x248 PF: > { %s14_s19 = sadd.s32 1, %s730_s19   ;;  %s842_s15 = smov %s722_s17 }
 0x249   : > { %p11_p10 = scmp.ge.s32.totalorder %s14_s19, 10   ;;  %s843_s16 = smov %s726_s18 }
 0x24a   : > { %s844_s17 = smov %s847_s20  ;;  %s845_s18 = smov %s851_s21 }
 0x24b   :  { %13 = sbr.rel (!%p11_p10) target bundleno = 3 (0x3), region = 75 }

// kernel: _lambda_.7
= control target key start
LH: loop header
LB: loop body
LE: loop exit
PB: predicated region body
PF: predicated region fallthrough
CT: control target
= control target key end

     0   :  { %9 = vsyncpa [#allocation3], 0  ;;  %s669_s15 = smov 0   ;;  %s671_s16 = smov 0   ;;  %s770_s0 = inlined_call_operand.vmem [shape: f32[2], index: 0, kind: input, shape index: {}]   ;;  %s771_s1 = inlined_call_operand.vmem [shape: f32[2,8,32], index: 1, kind: input, shape index: {}]   ;;  %s772_s2 = inlined_call_operand.vmem [shape: bf16[32,96], index: 2, kind: input, shape index: {}]   ;;  %s773_s3 = inlined_call_operand.vmem [shape: f32[1,96], index: 3, kind: input, shape index: {}]   ;;  %s774_s4 = inlined_call_operand.vmem [shape: bf16[2,12,8,8], index: 4, kind: output, shape index: {}]  }
   0x1   :  { %s673_s17 = smov 0  }
   0x2 LB: > { %s492_s18 = sadd.s32 4294967295, %s628_s17   ;;  %s27_s19 = sadd.s32 1, %s624_s16  ;;  %s628_s17 = sphi %s673_s17, %s15_s17   ;;  %s624_s16 = sphi %s671_s16, %s778_s16   ;;  %s620_s15 = sphi %s669_s15, %s777_s15  }
   0x3   : > { %p29_p0 = scmp.ge.s32.totalorder %s27_s19, 2  ;;  %p494_p1 = scmp.ge.s32.totalorder %s628_s17, 1 }
   0x4   : > { %p151_p2 = scmp.lt.s32.totalorder %s628_s17, 3  ;;  %p694_p4 = scmp.eq.s32.totalorder %s492_s18, 0 }
   0x5   : > { %s780_s19 = smov (%p29_p0, %s27_s19), 0  ;;  %s164_s24 = sshll.u32 %s770_s0, 4  ;;  %s165_s24 = int_to_ptr.vmem [resolvable:$true] %s164_s24 }
   0x6   : > { %p690_p3 = pnand %p494_p1, %p151_p2  ;;  %s587_s25 = scalar_lea.vmem %s165_s24, 16 }
   0x7   : > { %p588_p7 = scmp.ne.s32.totalorder %s165_s24, %s587_s25  ;;  %p595_p11 = scmp.lt.s32.totalorder %s165_s24, %s165_s24 }
   0x8   : > { %p537_p5 = pneg %p690_p3  ;;  %p596_p12 = scmp.lt.s32.totalorder %s587_s25, %s587_s25 }
   0xa   : > { %p538_p6 = pnand %p694_p4, %p537_p5  ;;  %p597_p13 = por %p596_p12, %p595_p11 }
   0xc   : > { %p589_p8 = pneg %p538_p6 }
   0xe   : > { %p590_p9 = pnand %p589_p8, %p588_p7 }
  0x10   : > { %p591_p10 = pneg %p590_p9 }
  0x12   : > { %p598_p0 = pnand %p597_p13, %p591_p10 }
  0x14   : > { %601 = shalt.err (!%p598_p0)
}
  0x15   : > { %s630_s26 = smov [#allocation2]   ;;  %193 = sbr.rel (%p690_p3) target bundleno = 706 (0x2c2), region = 36 }
  0x16   : > { %540 = dma.vmem_to_smem (!%p538_p6), %s165_s24, 16, %s630_s26, [#allocation3]  }
  0x1a   : > { %615 = dma.done.wait (%p694_p4), [#allocation3], 16  }
  0x1b   : > { %617 = vsyncadd (%p694_p4), [#allocation3], 4294967280 }
  0x1c   : > { %199 = sfence }
  0x1d   : > { %p225_p1 = scmp.lt.s32.totalorder %s620_s15, 1  ;;  %vm244_vm0 = vcmask 261120   ;;  %v581_v7 = vld [vmem:[%s772_s2 + $0x8] sm:$0xff]   ;;  %v631_v8 = vmov 0.0   ;;  %vm632_vm1 = vmmov 0   ;;  %v582_v9 = vld [vmem:[%s772_s2] sm:$0xff]  }
  0x1e   : > { %524 = vmatprep.subr.bf16.mxu0 %v631_v8  ;;  %528 = vmatprep.mubr.msk.bf16.mxu0 %vm632_vm1, %v631_v8  ;;  %s242_s9 = sld [smem:[#allocation2]]  ;;  %v502_v25 = vld [vmem:[%s773_s3] ss:$0 sm:$0xff]  ;;  %vm339_vm4 = vcmask 60416   ;;  %s633_s21 = smov 104  }
  0x1f   : > { %s782_s15 = smov (!%p225_p1, %s620_s15), 1  ;;  %525 = vmatpush3.bf16.msra.mxu0 %v581_v7  ;;  %s501_s10 = sld [smem:[#allocation2 + $0x1]] }
  0x20   : > { %s499_s27 = sshll.u32 %s782_s15, 3  ;;  %526 = vmatprep.subr.bf16.mxu0 %v631_v8  ;;  %s532_s11 = smul.u32 48, %s782_s15 }
  0x21   : > { %s231_s30 = scalar_lea.vmem %s771_s1, %s499_s27  ;;  %s634_s22 = smov 120  }
  0x22   : > { %v241_v0 = vld [vmem:[%s231_s30] sm:$0xff]  ;;  %s735_s20 = scalar_lea.vmem %s774_s4, %s532_s11  ;;  %s635_s15 = smov 48  }
  0x23   : > { %v245_v1 = vsel %vm244_vm0, %v241_v0, 0.0  ;;  %527 = vmatpush3.bf16.msra.mxu0 %v582_v9  ;;  %s636_s23 = smov 112   ;;  %s637_s24 = smov 96  }
  0x24   : > { %246 = vadd.xlane.f32.xlu0 %v245_v1  ;;  %v266_v18 = vstv %s242_s9  ;;  %s638_s25 = smov 88   ;;  %s639_s26 = smov 80  }
  0x25   : > { %v269_v21 = vstv %s501_s10  ;;  %s640_s27 = smov 72   ;;  %s641_s28 = smov 64  }
  0x26   : > { %s642_s29 = smov 56   ;;  %s643_s30 = smov 40  }
  0xad   : > { %v247_v2 = vpop.xlane.xlu0 %246 }
  0xae   : > { %v249_v3 = vmul.f32 0.03125, %v247_v2 }
  0xb0   : > { %v250_v4 = vsub.f32 %v241_v0, %v249_v3 }
  0xb2   : > { %v251_v5 = vmul.f32 %v250_v4, %v250_v4  ;;  %v267_v19 = vmul.f32 %v266_v18, %v250_v4 }
  0xb4   : > { %v252_v6 = vsel %vm244_vm0, %v251_v5, 0.0 }
  0xb5   : > { %253 = vadd.xlane.f32.xlu0 %v252_v6 }
 0x13e   : > { %v254_v10 = vpop.xlane.xlu0 %253 }
 0x13f   : > { %v256_v11 = vmul.f32 0.032258064, %v254_v10 }
 0x141   : > { %583 = vrsqrt.f32 %v256_v11  ;;  %vm259_vm2 = vcmp.eq.f32.partialorder %v256_v11, inf  ;;  %v262_v14 = vand.u32 2147483648, %v256_v11  ;;  %vm261_vm3 = vcmp.eq.f32.partialorder %v256_v11, 0.0 }
 0x14e   : > { %v584_v12 = vpop.eup %583 }
 0x14f   : > { %v258_v13 = vmul.f32 %v584_v12, %v256_v11 }
 0x151   : > { %v260_v15 = vsel %vm259_vm2, %v256_v11, %v258_v13 }
 0x152   : > { %v263_v16 = vsel %vm261_vm3, %v262_v14, %v260_v15 }
 0x153   : > { %v264_v17 = vadd.f32 1e-06, %v263_v16 }
 0x155   : > { %585 = vrcp.f32 %v264_v17 }
 0x162   : > { %v586_v20 = vpop.eup %585 }
 0x163   : > { %v268_v22 = vmul.f32 %v586_v20, %v267_v19 }
 0x165   : > { %v270_v23 = vadd.f32 %v269_v21, %v268_v22 }
 0x167   : > { %v271_v24 = vpack.c.bf16 %v270_v23, %v270_v23 }
 0x169   : > { %529 = vmatmul.mubr.msk.bf16.vlgmr.msra.gmra.mxu0 %vm244_vm0, %v271_v24 }
 0x229   : > { %v332_v26 = vpop.f32.mrf.mxu0 }
 0x22a   : > { %v333_v27 = vadd.f32 %v502_v25, %v332_v26 }
 0x22b   : > { %v530_v28 = vpop.f32.mrf.mxu0 }
 0x22c   : > { %v338_v29 = vpack.c.bf16 %v333_v27, %v333_v27 }
 0x22d   : > { %v335_v30 = vpop.f32.mrf.mxu0 }
 0x22e   : > { %354 = vrot.lane.b32.xlu0 %v338_v29, %s633_s21  ;;  %344 = vrot.lane.b32.xlu1 %v338_v29, %s634_s22  ;;  %340 = vst.msk [vmem:[%s735_s20] sm:$0xf] %vm339_vm4, %v338_v29 }
 0x22f   : > { %v531_v31 = vpop.f32.mrf.mxu0 }
 0x232   : > { %389 = vrot.lane.b32.xlu0 %v338_v29, %s635_s15  ;;  %349 = vrot.lane.b32.xlu1 %v338_v29, %s636_s23 }
 0x236   : > { %359 = vrot.lane.b32.xlu1 %v338_v29, %s637_s24 }
 0x23a   : > { %364 = vrot.lane.b32.xlu1 %v338_v29, %s638_s25 }
 0x23e   : > { %369 = vrot.lane.b32.xlu1 %v338_v29, %s639_s26 }
 0x242   : > { %374 = vrot.lane.b32.xlu1 %v338_v29, %s640_s27 }
 0x246   : > { %379 = vrot.lane.b32.xlu1 %v338_v29, %s641_s28 }
 0x24a   : > { %384 = vrot.lane.b32.xlu1 %v338_v29, %s642_s29 }
 0x24e   : > { %394 = vrot.lane.b32.xlu1 %v338_v29, %s643_s30 }
 0x2a0   : > { %v355_v32 = vpop.permute.xlu0 %354  ;;  %v345_v33 = vpop.permute.xlu1 %344 }
 0x2a1   : > { %509 = vst.msk [vmem:[%s735_s20 + $0xc] sm:$0xf] %vm339_vm4, %v355_v32  ;;  %507 = vst.msk [vmem:[%s735_s20 + $0x4] sm:$0xf] %vm339_vm4, %v345_v33 }
 0x2a4   : > { %v390_v34 = vpop.permute.xlu0 %389  ;;  %v350_v35 = vpop.permute.xlu1 %349 }
 0x2a5   : > { %516 = vst.msk [vmem:[%s735_s20 + $0x28] sm:$0xf] %vm339_vm4, %v390_v34  ;;  %508 = vst.msk [vmem:[%s735_s20 + $0x8] sm:$0xf] %vm339_vm4, %v350_v35 }
 0x2a8   : > { %v360_v36 = vpop.permute.xlu1 %359 }
 0x2a9   : > { %510 = vst.msk [vmem:[%s735_s20 + $0x10] sm:$0xf] %vm339_vm4, %v360_v36 }
 0x2ac   : > { %v365_v37 = vpop.permute.xlu1 %364 }
 0x2ad   : > { %511 = vst.msk [vmem:[%s735_s20 + $0x14] sm:$0xf] %vm339_vm4, %v365_v37 }
 0x2b0   : > { %v370_v38 = vpop.permute.xlu1 %369 }
 0x2b1   : > { %512 = vst.msk [vmem:[%s735_s20 + $0x18] sm:$0xf] %vm339_vm4, %v370_v38 }
 0x2b4   : > { %v375_v39 = vpop.permute.xlu1 %374 }
 0x2b5   : > { %513 = vst.msk [vmem:[%s735_s20 + $0x1c] sm:$0xf] %vm339_vm4, %v375_v39 }
 0x2b8   : > { %v380_v40 = vpop.permute.xlu1 %379 }
 0x2b9   : > { %514 = vst.msk [vmem:[%s735_s20 + $0x20] sm:$0xf] %vm339_vm4, %v380_v40 }
 0x2bc   : > { %v385_v41 = vpop.permute.xlu1 %384 }
 0x2bd   : > { %515 = vst.msk [vmem:[%s735_s20 + $0x24] sm:$0xf] %vm339_vm4, %v385_v41 }
 0x2c0   : > { %v395_v42 = vpop.permute.xlu1 %394 }
 0x2c1   : > { %517 = vst.msk [vmem:[%s735_s20 + $0x2c] sm:$0xf] %vm339_vm4, %v395_v42 }
 0x2c2 PF: > { %s15_s17 = sadd.s32 1, %s628_s17   ;;  %s777_s15 = smov %s624_s16 }
 0x2c3   : > { %p12_p2 = scmp.ge.s32.totalorder %s15_s17, 4   ;;  %s778_s16 = smov %s780_s19 }
 0x2c5   :  { %14 = sbr.rel (!%p12_p2) target bundleno = 2 (0x2), region = 82 }
 0x2ca   :  { %426 = vsyncpa [#allocation3], 1 }
 0x2cb   :  { %428 = vsyncpa [#allocation3 + $0x1], 1 }

// kernel: _lambda_.13
= control target key start
LH: loop header
LB: loop body
LE: loop exit
PB: predicated region body
PF: predicated region fallthrough
CT: control target
= control target key end

     0   :  { %7 = vsyncpa [#allocation4], 0  ;;  %s183_s0 = inlined_call_operand.vmem [shape: f32[2], index: 0, kind: input, shape index: {}]   ;;  %s184_s1 = inlined_call_operand.vmem [shape: f32[16,32], index: 1, kind: input, shape index: {}]   ;;  %s185_s2 = inlined_call_operand.hbm [shape: f32[16,32], index: 2, kind: output, shape index: {}]  }
   0x1   :  { %8 = vsyncpa [#allocation3], 0  ;;  %s15_s11 = sshll.u32 %s183_s0, 4  ;;  %s16_s11 = int_to_ptr.vmem [resolvable:$true] %s15_s11 }
   0x2   :  { %s110_s12 = scalar_lea.vmem %s16_s11, 16  ;;  %p115_p1 = scmp.lt.s32.totalorder %s16_s11, %s16_s11 }
   0x3   :  { %p111_p0 = scmp.ne.s32.totalorder %s16_s11, %s110_s12  ;;  %p116_p2 = scmp.lt.s32.totalorder %s110_s12, %s110_s12 }
   0x5   :  { %p117_p3 = por %p116_p2, %p115_p1 }
   0x7   :  { %p118_p4 = pnand %p117_p3, %p111_p0 }
   0x9   :  { %121 = shalt.err (!%p118_p4)
}
   0xa   :  { %s146_s13 = smov [#allocation2]  }
   0xb   :  { %18 = dma.vmem_to_smem %s16_s11, 16, %s146_s13, [#allocation4]  }
   0xc   :  { %142 = dma.done.wait [#allocation4], 16  }
   0xd   :  { %143 = vsyncadd [#allocation4], 4294967280 }
   0xe   :  { %24 = sfence }
   0xf   :  { %v25_v0 = vld [vmem:[%s184_s1] sm:$0xff]  ;;  %vm29_vm0 = vcmask 261120   ;;  %v26_v1 = vld [vmem:[%s184_s1 + $0x8] sm:$0xff]  ;;  %s27_s1 = sld [smem:[#allocation2]]  ;;  %s147_s18 = smov [#allocation5]  }
  0x10   :  { %v30_v2 = vsel %vm29_vm0, %v25_v0, 0.0  ;;  %v33_v3 = vsel %vm29_vm0, %v26_v1, 0.0  ;;  %s97_s17 = sld [smem:[#allocation2 + $0x1]]  ;;  %s85_s19 = sshll.u32 %s147_s18, 4  ;;  %s86_s19 = int_to_ptr.vmem [resolvable:$true] %s85_s19 }
  0x11   :  { %31 = vadd.xlane.f32.xlu0 %v30_v2  ;;  %s122_s20 = scalar_lea.vmem %s86_s19, 256  ;;  %p127_p6 = scmp.lt.s32.totalorder %s86_s19, %s86_s19 }
  0x12   :  { %p123_p5 = scmp.ne.s32.totalorder %s86_s19, %s122_s20  ;;  %p128_p7 = scmp.lt.s32.totalorder %s122_s20, %s122_s20 }
  0x14   :  { %p129_p8 = por %p128_p7, %p127_p6 }
  0x15   :  { %34 = vadd.xlane.f32.xlu0 %v33_v3  ;;  %v70_v30 = vstv %s27_s1 }
  0x16   :  { %v75_v33 = vstv %s97_s17  ;;  %p130_p9 = pnand %p129_p8, %p123_p5 }
  0x9a   :  { %v32_v4 = vpop.xlane.xlu0 %31 }
  0x9b   :  { %v37_v5 = vmul.f32 0.03125, %v32_v4 }
  0x9d   :  { %v39_v6 = vsub.f32 %v25_v0, %v37_v5 }
  0x9e   :  { %v35_v7 = vpop.xlane.xlu0 %34 }
  0x9f   :  { %v38_v8 = vmul.f32 0.03125, %v35_v7  ;;  %v41_v9 = vmul.f32 %v39_v6, %v39_v6  ;;  %v71_v31 = vmul.f32 %v70_v30, %v39_v6 }
  0xa1   :  { %v40_v10 = vsub.f32 %v26_v1, %v38_v8  ;;  %v43_v11 = vsel %vm29_vm0, %v41_v9, 0.0 }
  0xa2   :  { %44 = vadd.xlane.f32.xlu1 %v43_v11 }
  0xa3   :  { %v42_v12 = vmul.f32 %v40_v10, %v40_v10  ;;  %v72_v35 = vmul.f32 %v70_v30, %v40_v10 }
  0xa5   :  { %v46_v13 = vsel %vm29_vm0, %v42_v12, 0.0 }
  0xa6   :  { %47 = vadd.xlane.f32.xlu1 %v46_v13 }
 0x12b   :  { %v45_v14 = vpop.xlane.xlu1 %44 }
 0x12c   :  { %v50_v15 = vmul.f32 0.032258064, %v45_v14 }
 0x12e   :  { %102 = vrsqrt.f32 %v50_v15  ;;  %vm54_vm1 = vcmp.eq.f32.partialorder %v50_v15, inf  ;;  %v57_v20 = vand.u32 2147483648, %v50_v15  ;;  %vm56_vm2 = vcmp.eq.f32.partialorder %v50_v15, 0.0 }
 0x12f   :  { %v48_v16 = vpop.xlane.xlu1 %47 }
 0x130   :  { %v51_v17 = vmul.f32 0.032258064, %v48_v16 }
 0x132   :  { %104 = vrsqrt.f32 %v51_v17  ;;  %vm61_vm3 = vcmp.eq.f32.partialorder %v51_v17, inf  ;;  %v64_v26 = vand.u32 2147483648, %v51_v17  ;;  %vm63_vm4 = vcmp.eq.f32.partialorder %v51_v17, 0.0 }
 0x13b   :  { %v103_v18 = vpop.eup %102 }
 0x13c   :  { %v53_v19 = vmul.f32 %v103_v18, %v50_v15 }
 0x13e   :  { %v55_v21 = vsel %vm54_vm1, %v50_v15, %v53_v19 }
 0x13f   :  { %v105_v22 = vpop.eup %104  ;;  %v58_v23 = vsel %vm56_vm2, %v57_v20, %v55_v21 }
 0x140   :  { %v66_v24 = vadd.f32 1e-06, %v58_v23  ;;  %v60_v25 = vmul.f32 %v105_v22, %v51_v17 }
 0x142   :  { %106 = vrcp.f32 %v66_v24  ;;  %v62_v27 = vsel %vm61_vm3, %v51_v17, %v60_v25 }
 0x143   :  { %v65_v28 = vsel %vm63_vm4, %v64_v26, %v62_v27 }
 0x144   :  { %v67_v29 = vadd.f32 1e-06, %v65_v28 }
 0x146   :  { %108 = vrcp.f32 %v67_v29 }
 0x14f   :  { %v107_v32 = vpop.eup %106 }
 0x150   :  { %v73_v34 = vmul.f32 %v107_v32, %v71_v31 }
 0x152   :  { %v76_v36 = vadd.f32 %v75_v33, %v73_v34 }
 0x153   :  { %v109_v37 = vpop.eup %108 }
 0x154   :  { %v74_v38 = vmul.f32 %v109_v37, %v72_v35  ;;  %78 = vst.msk [vmem:[#allocation5] sm:$0xff] %vm29_vm0, %v76_v36 }
 0x156   :  { %v77_v39 = vadd.f32 %v75_v33, %v74_v38 }
 0x158   :  { %79 = vst.msk [vmem:[#allocation5 + $0x8] sm:$0xff] %vm29_vm0, %v77_v39 }
 0x159   :  { %133 = shalt.err (!%p130_p9)
}
 0x15a   :  { %s148_s21 = smov 128   ;;  %s149_s22 = smov 8  }
 0x15b   :  { %91 = dma.vmem_to_hbm [thread:$0]  %s86_s19, 256, %s185_s2, [#allocation3], %s148_s21, %s148_s21, %s149_s22  }
 0x15c   :  { %144 = dma.done.wait [#allocation3], 256  }
 0x15d   :  { %145 = vsyncadd [#allocation3], 4294967040 }
 0x15e   :  { %95 = vsyncpa [#allocation3], 1 }
 0x15f   :  { %96 = vsyncpa [#allocation4], 1 }

// kernel: _lambda_.9
= control target key start
LH: loop header
LB: loop body
LE: loop exit
PB: predicated region body
PF: predicated region fallthrough
CT: control target
= control target key end

     0   :  { %14 = vsyncpa [#allocation3], 0  ;;  %s1021_s30 = smov 0   ;;  %s1023_s10 = smov 0   ;;  %s1148_s0 = inlined_call_operand.vmem [shape: f32[2], index: 0, kind: input, shape index: {}]   ;;  %s1149_s1 = inlined_call_operand.vmem [shape: f32[2,8,32], index: 1, kind: input, shape index: {}]   ;;  %s1150_s2 = inlined_call_operand.vmem [shape: bf16[2,4,8,8], index: 2, kind: input, shape index: {}]   ;;  %s1151_s3 = inlined_call_operand.vmem [shape: bf16[32,32], index: 3, kind: input, shape index: {}]   ;;  %s1152_s4 = inlined_call_operand.vmem [shape: f32[1,32], index: 4, kind: input, shape index: {}]   ;;  %s1153_s5 = inlined_call_operand.vmem [shape: bf16[32,64], index: 5, kind: input, shape index: {}]   ;;  %s1154_s6 = inlined_call_operand.vmem [shape: f32[1,64], index: 6, kind: input, shape index: {}]   ;;  %s1155_s7 = inlined_call_operand.vmem [shape: bf16[64,32], index: 7, kind: input, shape index: {}]   ;;  %s1156_s8 = inlined_call_operand.vmem [shape: f32[1,32], index: 8, kind: input, shape index: {}]   ;;  %s1157_s9 = inlined_call_operand.vmem [shape: f32[2,8,32], index: 9, kind: output, shape index: {}]  }
   0x1   :  { %s1025_s11 = smov 0  }
   0x2 LB: > { %s793_s12 = sadd.s32 4294967295, %s963_s11   ;;  %s32_s13 = sadd.s32 1, %s959_s10  ;;  %s963_s11 = sphi %s1025_s11, %s20_s11   ;;  %s959_s10 = sphi %s1023_s10, %s1161_s10   ;;  %s955_s30 = sphi %s1021_s30, %s1160_s30  }
   0x3   : > { %p34_p0 = scmp.ge.s32.totalorder %s32_s13, 2  ;;  %p795_p1 = scmp.ge.s32.totalorder %s963_s11, 1 }
   0x4   : > { %p268_p2 = scmp.lt.s32.totalorder %s963_s11, 3  ;;  %p1046_p4 = scmp.eq.s32.totalorder %s793_s12, 0 }
   0x5   : > { %s1163_s13 = smov (%p34_p0, %s32_s13), 0  ;;  %s281_s18 = sshll.u32 %s1148_s0, 4  ;;  %s282_s18 = int_to_ptr.vmem [resolvable:$true] %s281_s18 }
   0x6   : > { %p1042_p3 = pnand %p795_p1, %p268_p2  ;;  %s922_s19 = scalar_lea.vmem %s282_s18, 16 }
   0x7   : > { %p923_p7 = scmp.ne.s32.totalorder %s282_s18, %s922_s19  ;;  %p930_p11 = scmp.lt.s32.totalorder %s282_s18, %s282_s18 }
   0x8   : > { %p871_p5 = pneg %p1042_p3  ;;  %p931_p12 = scmp.lt.s32.totalorder %s922_s19, %s922_s19 }
   0xa   : > { %p872_p6 = pnand %p1046_p4, %p871_p5  ;;  %p932_p13 = por %p931_p12, %p930_p11 }
   0xc   : > { %p924_p8 = pneg %p872_p6 }
   0xe   : > { %p925_p9 = pnand %p924_p8, %p923_p7 }
  0x10   : > { %p926_p10 = pneg %p925_p9 }
  0x12   : > { %p933_p0 = pnand %p932_p13, %p926_p10 }
  0x14   : > { %936 = shalt.err (!%p933_p0)
}
  0x15   : > { %s965_s20 = smov [#allocation2]   ;;  %333 = sbr.rel (%p1042_p3) target bundleno = 1077 (0x435), region = 56 }
  0x16   : > { %874 = dma.vmem_to_smem (!%p872_p6), %s282_s18, 16, %s965_s20, [#allocation3]  }
  0x1a   : > { %950 = dma.done.wait (%p1046_p4), [#allocation3], 16  }
  0x1b   : > { %952 = vsyncadd (%p1046_p4), [#allocation3], 4294967280 }
  0x1c   : > { %339 = sfence }
  0x1d   : > { %p382_p1 = scmp.lt.s32.totalorder %s955_s30, 1  ;;  %v910_v0 = vld [vmem:[%s1151_s3 + $0x8] sm:$0xff]   ;;  %v966_v1 = vmov 0.0   ;;  %v911_v2 = vld [vmem:[%s1151_s3] sm:$0xff]   ;;  %vm967_vm0 = vmmov 0   ;;  %s968_s29 = smov 8  }
  0x1e   : > { %839 = vmatprep.subr.bf16.mxu1 %v966_v1  ;;  %855 = vmatprep.subr.bf16.mxu0 %v966_v1  ;;  %s969_s12 = smov 24   ;;  %s970_s14 = smov 16   ;;  %vm428_vm1 = vcmask 64512   ;;  %vm432_vm2 = vcmask 130048   ;;  %vm435_vm3 = vcmask 195584   ;;  %vm454_vm4 = vcmask 261120  }
  0x1f   : > { %s1165_s30 = smov (!%p382_p1, %s955_s30), 1  ;;  %840 = vmatpush3.bf16.msra.mxu1 %v910_v0  ;;  %843 = vmatprep.mubr.msk.bf16.mxu1 %vm967_vm0, %v966_v1  ;;  %v813_v15 = vld [vmem:[%s1152_s4] ss:$0 sm:$0xff]  ;;  %v912_v27 = vld [vmem:[%s1153_s5 + $0x8] sm:$0xff]   ;;  %v914_v29 = vld [vmem:[%s1155_s7 + $0x18] sm:$0xff]   ;;  %vm642_vm7 = vcmask 523264  }
  0x20   : > { %841 = vmatprep.subr.bf16.mxu1 %v966_v1  ;;  %s827_s25 = sshll.u32 %s1165_s30, 4  ;;  %863 = vmatprep.mubr.msk.bf16.mxu0 %vm967_vm0, %v966_v1  ;;  %s800_s15 = sshll.u32 %s1165_s30, 3  ;;  %v913_v28 = vld [vmem:[%s1153_s5] sm:$0xff]   ;;  %v915_v30 = vld [vmem:[%s1155_s7 + $0x10] sm:$0xff]   ;;  %v916_v46 = vld [vmem:[%s1155_s7 + $0x8] sm:$0xff]  }
  0x21   : > { %s396_s28 = scalar_lea.vmem %s1150_s2, %s827_s25  ;;  %s388_s18 = scalar_lea.vmem %s1149_s1, %s800_s15  ;;  %856 = vmatpush3.bf16.msra.mxu0 %v914_v29  ;;  %v917_v47 = vld [vmem:[%s1155_s7] sm:$0xff]  }
  0x22   : > { %v907_v3 = vld [vmem:[%s396_s28 + $0x4] ss:$0 sps:$4 sm:$0xff]   ;;  %v909_v4 = vld [vmem:[%s396_s28 + $0xc] ss:$0 sps:$4 sm:$0xff]   ;;  %v908_v5 = vld [vmem:[%s396_s28 + $0x8] ss:$0 sps:$4 sm:$0xff]   ;;  %857 = vmatprep.subr.bf16.mxu0 %v966_v1  ;;  %s403_s25 = scalar_lea.vmem %s1157_s9, %s800_s15 }
  0x23   : > { %842 = vmatpush3.bf16.msra.mxu1 %v911_v2  ;;  %416 = vrot.lane.b32.xlu0 %v907_v3, %s968_s29  ;;  %v406_v7 = vld [vmem:[%s396_s28] sm:$0xf]  ;;  %s506_s29 = sld [smem:[#allocation2]] }
  0x24   : > { %847 = vmatprep.subr.bf16.mxu1 %v966_v1  ;;  %426 = vrot.lane.b32.xlu1 %v909_v4, %s969_s12  ;;  %v405_v13 = vld [vmem:[%s388_s18] sm:$0xff]  ;;  %s814_s12 = sld [smem:[#allocation2 + $0x1]] }
  0x25   : > { %858 = vmatpush3.bf16.msra.mxu0 %v915_v30  ;;  %v815_v48 = vld [vmem:[%s1154_s6] ss:$0 sm:$0xff] }
  0x26   : > { %859 = vmatprep.subr.bf16.mxu0 %v966_v1  ;;  %v819_v56 = vld [vmem:[%s1156_s8] ss:$0 sm:$0xff] }
  0x27   : > { %421 = vrot.lane.b32.xlu0 %v908_v5, %s970_s14 }
  0x29   : > { %v529_v39 = vstv %s506_s29  ;;  %860 = vmatpush3.bf16.msra.mxu0 %v916_v46 }
  0x2a   : > { %v532_v42 = vstv %s814_s12  ;;  %861 = vmatprep.subr.bf16.mxu0 %v966_v1 }
  0x2d   : > { %862 = vmatpush3.bf16.msra.mxu0 %v917_v47 }
  0x95   : > { %v417_v6 = vpop.permute.xlu0 %416 }
  0x96   : > { %v427_v8 = vpop.permute.xlu1 %426  ;;  %v431_v9 = vsel %vm428_vm1, %v406_v7, %v417_v6 }
  0x99   : > { %v422_v10 = vpop.permute.xlu0 %421 }
  0x9a   : > { %v434_v11 = vsel %vm432_vm2, %v431_v9, %v422_v10 }
  0x9b   : > { %v437_v12 = vsel %vm435_vm3, %v434_v11, %v427_v8 }
  0x9c   : > { %844 = vmatmul.mubr.msk.bf16.vlgmr.msra.gmra.mxu1 %vm454_vm4, %v437_v12 }
  0x9d   : > { %851 = vmatprep.mubr.msk.bf16.mxu1 %vm967_vm0, %v966_v1  ;;  %848 = vmatpush3.bf16.msra.mxu1 %v912_v27 }
  0x9e   : > { %849 = vmatprep.subr.bf16.mxu1 %v966_v1 }
  0xa1   : > { %850 = vmatpush3.bf16.msra.mxu1 %v913_v28 }
 0x15c   : > { %v491_v14 = vpop.f32.mrf.mxu1 }
 0x15d   : > { %v497_v16 = vadd.f32 %v491_v14, %v405_v13 }
 0x15e   : > { %v845_v17 = vpop.f32.mrf.mxu1 }
 0x15f   : > { %v1097_v18 = vadd.f32 %v813_v15, %v497_v16 }
 0x160   : > { %v494_v19 = vpop.f32.mrf.mxu1 }
 0x161   : > { %v508_v20 = vsel %vm454_vm4, %v1097_v18, 0.0 }
 0x162   : > { %v846_v21 = vpop.f32.mrf.mxu1  ;;  %509 = vadd.xlane.f32.xlu1 %v508_v20 }
 0x1eb   : > { %v510_v22 = vpop.xlane.xlu1 %509 }
 0x1ec   : > { %v512_v23 = vmul.f32 0.03125, %v510_v22 }
 0x1ee   : > { %v513_v24 = vsub.f32 %v1097_v18, %v512_v23 }
 0x1f0   : > { %v514_v25 = vmul.f32 %v513_v24, %v513_v24  ;;  %v530_v40 = vmul.f32 %v529_v39, %v513_v24 }
 0x1f2   : > { %v515_v26 = vsel %vm454_vm4, %v514_v25, 0.0 }
 0x1f3   : > { %516 = vadd.xlane.f32.xlu0 %v515_v26 }
 0x27c   : > { %v517_v31 = vpop.xlane.xlu0 %516 }
 0x27d   : > { %v519_v32 = vmul.f32 0.032258064, %v517_v31 }
 0x27f   : > { %918 = vrsqrt.f32 %v519_v32  ;;  %vm522_vm5 = vcmp.eq.f32.partialorder %v519_v32, inf  ;;  %v525_v35 = vand.u32 2147483648, %v519_v32  ;;  %vm524_vm6 = vcmp.eq.f32.partialorder %v519_v32, 0.0 }
 0x28c   : > { %v919_v33 = vpop.eup %918 }
 0x28d   : > { %v521_v34 = vmul.f32 %v919_v33, %v519_v32 }
 0x28f   : > { %v523_v36 = vsel %vm522_vm5, %v519_v32, %v521_v34 }
 0x290   : > { %v526_v37 = vsel %vm524_vm6, %v525_v35, %v523_v36 }
 0x291   : > { %v527_v38 = vadd.f32 1e-06, %v526_v37 }
 0x293   : > { %920 = vrcp.f32 %v527_v38 }
 0x2a0   : > { %v921_v41 = vpop.eup %920 }
 0x2a1   : > { %v531_v43 = vmul.f32 %v921_v41, %v530_v40 }
 0x2a3   : > { %v533_v44 = vadd.f32 %v532_v42, %v531_v43 }
 0x2a5   : > { %v534_v45 = vpack.c.bf16 %v533_v44, %v533_v44 }
 0x2a7   : > { %852 = vmatmul.mubr.msk.bf16.vlgmr.msra.gmra.mxu1 %vm454_vm4, %v534_v45 }
 0x367   : > { %v595_v49 = vpop.f32.mrf.mxu1 }
 0x368   : > { %v596_v50 = vadd.f32 %v815_v48, %v595_v49 }
 0x369   : > { %v853_v51 = vpop.f32.mrf.mxu1 }
 0x36a   : > { %v601_v52 = vmax.f32 %v596_v50, 0.0 }
 0x36b   : > { %v598_v53 = vpop.f32.mrf.mxu1 }
 0x36c   : > { %v602_v54 = vpack.c.bf16 %v601_v52, %v601_v52 }
 0x36d   : > { %v854_v55 = vpop.f32.mrf.mxu1 }
 0x36e   : > { %864 = vmatmul.mubr.msk.bf16.vlgmr.msra.gmra.mxu0 %vm642_vm7, %v602_v54 }
 0x42e   : > { %v680_v57 = vpop.f32.mrf.mxu0 }
 0x42f   : > { %v681_v58 = vadd.f32 %v819_v56, %v680_v57 }
 0x430   : > { %v865_v59 = vpop.f32.mrf.mxu0 }
 0x431   : > { %v686_v60 = vadd.f32 %v681_v58, %v1097_v18 }
 0x432   : > { %v683_v61 = vpop.f32.mrf.mxu0 }
 0x433   : > { %687 = vst.msk [vmem:[%s403_s25] sm:$0xff] %vm454_vm4, %v686_v60 }
 0x434   : > { %v866_v62 = vpop.f32.mrf.mxu0 }
 0x435 PF: > { %s20_s11 = sadd.s32 1, %s963_s11   ;;  %s1160_s30 = smov %s959_s10 }
 0x436   : > { %p17_p2 = scmp.ge.s32.totalorder %s20_s11, 4   ;;  %s1161_s10 = smov %s1163_s13 }
 0x438   :  { %19 = sbr.rel (!%p17_p2) target bundleno = 2 (0x2), region = 97 }
 0x43d   :  { %713 = vsyncpa [#allocation3], 1 }
 0x43e   :  { %715 = vsyncpa [#allocation3 + $0x1], 1 }

</bundles_post_ra>
